<compile_context>
chip_gen: v7x
topology: tpu7x:2x2x1
jax: 0.10.0
libtpu: 0.0.40
codegen_flags: <defaults>
</compile_context>

<pallas_src>
import math
import jax
import jax.numpy as jnp
from jax.experimental import pallas as pl
from jax.experimental.pallas import tpu as pltpu

# ----- synthetic "CLIP text tower" config (small, deterministic) -----
VOCAB = 64          # vocab size (EOT token = VOCAB-1, the largest id)
T = 8               # context length (sequence)
D = 32              # transformer width
H = 4               # attention heads
HD = D // H         # head dim
LAYERS = 2          # transformer layers
E = 32              # text_projection output dim
EPS = 1e-5
NEG_INF = -1e30


def _layer_norm(x, g, b):
    mu = jnp.mean(x, axis=-1, keepdims=True)
    var = jnp.mean((x - mu) ** 2, axis=-1, keepdims=True)
    return (x - mu) * jax.lax.rsqrt(var + EPS) * g + b


# ---------------------------------------------------------------------------
# Fused kernel: grid axis = layer.  Activation resident in VMEM scratch.
#   layer l:  x' = x + MHA(LN1(x));  x = x' + MLP(LN2(x'))
#   last l :  x_eot = sel @ x;  out = L2norm(ln_final(x_eot) @ text_projection)
# ---------------------------------------------------------------------------
def fused_text_encoder_kernel(
        x0_ref, mask_ref, sel_ref,
        ln1_g, ln1_b, w_qkv, b_qkv, w_o, b_o,
        ln2_g, ln2_b, w_fc, b_fc, w_pr, b_pr,
        lnf_g, lnf_b, w_proj,
        o_ref, x_scr):
    layer = pl.program_id(0)
    BT = x_scr.shape[0]
    B = BT // T

    # Load initial activations into the resident scratch on the first step.
    @pl.when(layer == 0)
    def _():
        x_scr[...] = x0_ref[...]

    x = x_scr[...]                                             # (B*T, D)

    # ---- LayerNorm 1 ----
    xn = _layer_norm(x, ln1_g[0], ln1_b[0])

    # ---- fused QKV projection: one matmul for all heads ----
    qkv = jnp.dot(xn, w_qkv[0], preferred_element_type=jnp.float32) + b_qkv[0]
    qkv3 = qkv.reshape(B, T, 3 * D)
    q3 = qkv3[..., 0 * D:1 * D]
    k3 = qkv3[..., 1 * D:2 * D]
    v3 = qkv3[..., 2 * D:3 * D]

    scale = jnp.float32(1.0 / math.sqrt(HD))
    mask = mask_ref[...]                                       # (T, T)

    # ---- causal self-attention, batched over B, static unroll over heads ----
    heads = []
    for h in range(H):
        qh = q3[..., h * HD:(h + 1) * HD]                      # (B, T, HD)
        kh = k3[..., h * HD:(h + 1) * HD]
        vh = v3[..., h * HD:(h + 1) * HD]
        s = jnp.einsum("bqd,bkd->bqk", qh, kh,
                       preferred_element_type=jnp.float32) * scale
        s = s + mask[None]
        s = s - jnp.max(s, axis=-1, keepdims=True)
        p = jnp.exp(s)
        p = p * pl.reciprocal(jnp.sum(p, axis=-1, keepdims=True), approx=True)
        heads.append(jnp.einsum("bqk,bkd->bqd", p, vh,
                                preferred_element_type=jnp.float32))
    # concatenate heads along lanes -> single out-projection matmul
    o_heads = jnp.concatenate(heads, axis=-1).reshape(BT, D)   # (B*T, D)
    attn = jnp.dot(o_heads, w_o[0], preferred_element_type=jnp.float32) + b_o[0]
    x1 = x + attn

    # ---- LayerNorm 2 + MLP (fc -> QuickGELU -> proj) ----
    x1n = _layer_norm(x1, ln2_g[0], ln2_b[0])
    hmid = jnp.dot(x1n, w_fc[0], preferred_element_type=jnp.float32) + b_fc[0]
    hmid = hmid * jax.nn.sigmoid(1.702 * hmid)                 # QuickGELU
    mlp = jnp.dot(hmid, w_pr[0], preferred_element_type=jnp.float32) + b_pr[0]
    x2 = x1 + mlp
    x_scr[...] = x2

    # ---- head on the last layer step ----
    @pl.when(layer == pl.num_programs(0) - 1)
    def _():
        # EOT gather as a one-hot selection matmul (avoids dynamic gather)
        x_eot = jnp.dot(sel_ref[...], x2,
                        preferred_element_type=jnp.float32)    # (B, D)
        xf = _layer_norm(x_eot, lnf_g[...], lnf_b[...])
        feats = jnp.dot(xf, w_proj[...],
                        preferred_element_type=jnp.float32)    # (B, E)
        ss = jnp.sum(feats * feats, axis=-1, keepdims=True)
        o_ref[...] = feats * jax.lax.rsqrt(jnp.maximum(ss, 1e-12))


# ---------------------------------------------------------------------------
# Wrapper: embedding glue + single pallas_call
# ---------------------------------------------------------------------------
def text_embedder_forward(text_token, params):
    B = text_token.shape[0]
    BT = B * T

    # glue: embedding lookup + positional embedding
    x0 = (params["tok_emb"][text_token]
          + params["pos_emb"][None, :, :]).astype(jnp.float32).reshape(BT, D)

    # constant causal mask, built once (not per layer / per batch element)
    mask = jnp.where(jnp.arange(T)[None, :] > jnp.arange(T)[:, None],
                     jnp.float32(NEG_INF), jnp.float32(0.0))

    # EOT-position selection matrix (argmax over token ids, as in CLIP)
    eot = jnp.argmax(text_token, axis=-1)                      # (B,)
    sel = jax.nn.one_hot(jnp.arange(B) * T + eot, BT, dtype=jnp.float32)

    const2d = lambda shp: pl.BlockSpec(shp, lambda l: (0, 0))
    per_layer = lambda shp: pl.BlockSpec((1,) + shp, lambda l: (l, 0, 0))

    feats = pl.pallas_call(
        fused_text_encoder_kernel,
        out_shape=jax.ShapeDtypeStruct((B, E), jnp.float32),
        grid=(LAYERS,),
        in_specs=[
            const2d((BT, D)),                               # x0 (resident)
            const2d((T, T)),                                # causal mask
            const2d((B, BT)),                               # EOT selection
            per_layer((1, D)), per_layer((1, D)),           # ln1 g, b
            per_layer((D, 3 * D)), per_layer((1, 3 * D)),   # qkv W, b
            per_layer((D, D)), per_layer((1, D)),           # out_proj W, b
            per_layer((1, D)), per_layer((1, D)),           # ln2 g, b
            per_layer((D, 4 * D)), per_layer((1, 4 * D)),   # fc W, b
            per_layer((4 * D, D)), per_layer((1, D)),       # proj W, b
            const2d((1, D)), const2d((1, D)),               # ln_final g, b
            const2d((D, E)),                                # text_projection
        ],
        out_specs=pl.BlockSpec((B, E), lambda l: (0, 0)),
        scratch_shapes=[pltpu.VMEM((BT, D), jnp.float32)],
        compiler_params=pltpu.CompilerParams(
            dimension_semantics=("arbitrary",)),
    )(x0, mask, sel,
      params["ln1_g"], params["ln1_b"], params["w_qkv"], params["b_qkv"],
      params["w_o"], params["b_o"], params["ln2_g"], params["ln2_b"],
      params["w_fc"], params["b_fc"], params["w_pr"], params["b_pr"],
      params["lnf_g"], params["lnf_b"], params["text_proj"])

    return feats[None, :, :]   # unsqueeze(0) -> (1, B, E)


# ---------------------------------------------------------------------------
# Parameter construction (deterministic, synthetic; per-layer weights stacked)
# ---------------------------------------------------------------------------
def init_params(key):
    ks = iter(jax.random.split(key, 8))
    nrm = lambda k, shp, s: jax.random.normal(k, shp, jnp.float32) * s
    return {
        "tok_emb": nrm(next(ks), (VOCAB, D), 0.02),
        "pos_emb": nrm(next(ks), (T, D), 0.01),
        "lnf_g": jnp.ones((1, D), jnp.float32),
        "lnf_b": jnp.zeros((1, D), jnp.float32),
        "text_proj": nrm(next(ks), (D, E), D ** -0.5),
        # per-layer parameters stacked along a leading layer axis
        "ln1_g": jnp.ones((LAYERS, 1, D), jnp.float32),
        "ln1_b": jnp.zeros((LAYERS, 1, D), jnp.float32),
        "w_qkv": nrm(next(ks), (LAYERS, D, 3 * D), D ** -0.5),
        "b_qkv": jnp.zeros((LAYERS, 1, 3 * D), jnp.float32),
        "w_o": nrm(next(ks), (LAYERS, D, D), D ** -0.5),
        "b_o": jnp.zeros((LAYERS, 1, D), jnp.float32),
        "ln2_g": jnp.ones((LAYERS, 1, D), jnp.float32),
        "ln2_b": jnp.zeros((LAYERS, 1, D), jnp.float32),
        "w_fc": nrm(next(ks), (LAYERS, D, 4 * D), D ** -0.5),
        "b_fc": jnp.zeros((LAYERS, 1, 4 * D), jnp.float32),
        "w_pr": nrm(next(ks), (LAYERS, 4 * D, D), (4 * D) ** -0.5),
        "b_pr": jnp.zeros((LAYERS, 1, D), jnp.float32),
    }


# ---------------------------------------------------------------------------
# Pure-JAX reference (same math) for a correctness check
# ---------------------------------------------------------------------------
def reference_forward(text_token, params):
    B = text_token.shape[0]
    x = params["tok_emb"][text_token] + params["pos_emb"][None, :, :]
    mask = jnp.where(jnp.arange(T)[None, :] > jnp.arange(T)[:, None],
                     NEG_INF, 0.0)
    for l in range(LAYERS):
        xn = _layer_norm(x, params["ln1_g"][l, 0], params["ln1_b"][l, 0])
        qkv = xn @ params["w_qkv"][l] + params["b_qkv"][l, 0]
        q, k, v = qkv[..., :D], qkv[..., D:2 * D], qkv[..., 2 * D:]
        qh = q.reshape(B, T, H, HD).transpose(0, 2, 1, 3)
        kh = k.reshape(B, T, H, HD).transpose(0, 2, 1, 3)
        vh = v.reshape(B, T, H, HD).transpose(0, 2, 1, 3)
        s = jnp.einsum("bhqd,bhkd->bhqk", qh, kh) / math.sqrt(HD) + mask
        p = jax.nn.softmax(s, axis=-1)
        oh = jnp.einsum("bhqk,bhkd->bhqd", p, vh)
        o = oh.transpose(0, 2, 1, 3).reshape(B, T, D)
        x = x + o @ params["w_o"][l] + params["b_o"][l, 0]
        xn2 = _layer_norm(x, params["ln2_g"][l, 0], params["ln2_b"][l, 0])
        hmid = xn2 @ params["w_fc"][l] + params["b_fc"][l, 0]
        hmid = hmid * jax.nn.sigmoid(1.702 * hmid)
        x = x + hmid @ params["w_pr"][l] + params["b_pr"][l, 0]
    eot = jnp.argmax(text_token, axis=-1)
    x_eot = x[jnp.arange(B), eot]
    feats = _layer_norm(x_eot, params["lnf_g"][0],
                        params["lnf_b"][0]) @ params["text_proj"]
    feats = feats / jnp.linalg.norm(feats, axis=-1, keepdims=True)
    return feats[None]


if __name__ == "__main__":
    key = jax.random.PRNGKey(0)
    kp, kt = jax.random.split(key)
    params = init_params(kp)

    # deterministic token ids: batch of 2 sequences, EOT (= VOCAB-1) placed so
    # argmax lands on it, zeros (padding) after.
    B = 2
    body = jax.random.randint(kt, (B, T), 1, VOCAB - 1)
    lengths = jnp.array([5, 7])
    pos = jnp.arange(T)[None, :]
    text_token = jnp.where(pos < (lengths[:, None] - 1), body, 0)
    text_token = jnp.where(pos == (lengths[:, None] - 1), VOCAB - 1, text_token)
    text_token = text_token.astype(jnp.int32)

    out = text_embedder_forward(text_token, params)
    out = jax.block_until_ready(out)

    ref = reference_forward(text_token, params)
    assert out.shape == (1, B, E), out.shape
    err = float(jnp.max(jnp.abs(out - ref)))
    assert jnp.allclose(out, ref, atol=2e-2, rtol=2e-2), err
    print("KERNEL_OK")
</pallas_src>

<mosaic_0001>
module attributes {stable_mosaic.version = 11 : i64} {
  func.func @fused_text_encoder_kernel(%arg0: i32, %arg1: memref<16x32xf32, #tpu.memory_space<vmem>>, %arg2: memref<8x8xf32, #tpu.memory_space<vmem>>, %arg3: memref<2x16xf32, #tpu.memory_space<vmem>>, %arg4: memref<1x1x32xf32, #tpu.memory_space<vmem>>, %arg5: memref<1x1x32xf32, #tpu.memory_space<vmem>>, %arg6: memref<1x32x96xf32, #tpu.memory_space<vmem>>, %arg7: memref<1x1x96xf32, #tpu.memory_space<vmem>>, %arg8: memref<1x32x32xf32, #tpu.memory_space<vmem>>, %arg9: memref<1x1x32xf32, #tpu.memory_space<vmem>>, %arg10: memref<1x1x32xf32, #tpu.memory_space<vmem>>, %arg11: memref<1x1x32xf32, #tpu.memory_space<vmem>>, %arg12: memref<1x32x128xf32, #tpu.memory_space<vmem>>, %arg13: memref<1x1x128xf32, #tpu.memory_space<vmem>>, %arg14: memref<1x128x32xf32, #tpu.memory_space<vmem>>, %arg15: memref<1x1x32xf32, #tpu.memory_space<vmem>>, %arg16: memref<1x32xf32, #tpu.memory_space<vmem>>, %arg17: memref<1x32xf32, #tpu.memory_space<vmem>>, %arg18: memref<32x32xf32, #tpu.memory_space<vmem>>, %arg19: memref<2x32xf32, #tpu.memory_space<vmem>>, %arg20: memref<16x32xf32, #tpu.memory_space<vmem>>) attributes {dimension_semantics = [#tpu.dimension_semantics<arbitrary>], iteration_bounds = array<i64: 2>, scalar_prefetch = 0 : i64, scratch_operands = 1 : i64, tpu.core_type = #tpu.core_type<tc>, window_params = [{pipeline_mode = #tpu.pipeline_mode<synchronous>, transform_indices = @transform_0, window_bounds = array<i64: 16, 32>}, {pipeline_mode = #tpu.pipeline_mode<synchronous>, transform_indices = @transform_1, window_bounds = array<i64: 8, 8>}, {pipeline_mode = #tpu.pipeline_mode<synchronous>, transform_indices = @transform_2, window_bounds = array<i64: 2, 16>}, {transform_indices = @transform_3, window_bounds = array<i64: 1, 1, 32>}, {transform_indices = @transform_4, window_bounds = array<i64: 1, 1, 32>}, {transform_indices = @transform_5, window_bounds = array<i64: 1, 32, 96>}, {transform_indices = @transform_6, window_bounds = array<i64: 1, 1, 96>}, {transform_indices = @transform_7, window_bounds = array<i64: 1, 32, 32>}, {transform_indices = @transform_8, window_bounds = array<i64: 1, 1, 32>}, {transform_indices = @transform_9, window_bounds = array<i64: 1, 1, 32>}, {transform_indices = @transform_10, window_bounds = array<i64: 1, 1, 32>}, {transform_indices = @transform_11, window_bounds = array<i64: 1, 32, 128>}, {transform_indices = @transform_12, window_bounds = array<i64: 1, 1, 128>}, {transform_indices = @transform_13, window_bounds = array<i64: 1, 128, 32>}, {transform_indices = @transform_14, window_bounds = array<i64: 1, 1, 32>}, {pipeline_mode = #tpu.pipeline_mode<synchronous>, transform_indices = @transform_15, window_bounds = array<i64: 1, 32>}, {pipeline_mode = #tpu.pipeline_mode<synchronous>, transform_indices = @transform_16, window_bounds = array<i64: 1, 32>}, {pipeline_mode = #tpu.pipeline_mode<synchronous>, transform_indices = @transform_17, window_bounds = array<i64: 32, 32>}, {pipeline_mode = #tpu.pipeline_mode<synchronous>, transform_indices = @transform_18, window_bounds = array<i64: 2, 32>}]} {
    %c0_i32 = arith.constant 0 : i32
    %0 = arith.cmpi eq, %arg0, %c0_i32 : i32
    %1 = arith.extui %0 : i1 to i32
    %c0_i32_0 = arith.constant 0 : i32
    %2 = arith.cmpi ne, %1, %c0_i32_0 : i32
    scf.if %2 {
      %c0_78 = arith.constant 0 : index
      %c0_79 = arith.constant 0 : index
      %185 = vector.load %arg1[%c0_78, %c0_79] : memref<16x32xf32, #tpu.memory_space<vmem>>, vector<16x32xf32>
      %c0_80 = arith.constant 0 : index
      %c0_81 = arith.constant 0 : index
      %186 = vector.load %arg20[%c0_80, %c0_81] : memref<16x32xf32, #tpu.memory_space<vmem>>, vector<16x32xf32>
      tpu.vector_store %arg20[%c0_80, %c0_81], %185 {strides = array<i32>} : memref<16x32xf32, #tpu.memory_space<vmem>>, vector<16x32xf32>,
    } else {
    }
    %c0 = arith.constant 0 : index
    %c0_1 = arith.constant 0 : index
    %3 = vector.load %arg20[%c0, %c0_1] : memref<16x32xf32, #tpu.memory_space<vmem>>, vector<16x32xf32>
    %c0_2 = arith.constant 0 : index
    %c0_3 = arith.constant 0 : index
    %c0_4 = arith.constant 0 : index
    %4 = vector.load %arg4[%c0_2, %c0_3, %c0_4] : memref<1x1x32xf32, #tpu.memory_space<vmem>>, vector<1x1x32xf32>
    %5 = vector.shape_cast %4 : vector<1x1x32xf32> to vector<1x32xf32>
    %c0_5 = arith.constant 0 : index
    %c0_6 = arith.constant 0 : index
    %c0_7 = arith.constant 0 : index
    %6 = vector.load %arg5[%c0_5, %c0_6, %c0_7] : memref<1x1x32xf32, #tpu.memory_space<vmem>>, vector<1x1x32xf32>
    %7 = vector.shape_cast %6 : vector<1x1x32xf32> to vector<1x32xf32>
    %cst = arith.constant dense<0.000000e+00> : vector<16xf32>
    %8 = vector.multi_reduction <add>, %3, %cst [1] : vector<16x32xf32> to vector<16xf32>
    %9 = vector.shape_cast %8 : vector<16xf32> to vector<16x1xf32>
    %cst_8 = arith.constant 3.200000e+01 : f32
    %10 = vector.broadcast %cst_8 : f32 to vector<16x1xf32>
    %11 = arith.divf %9, %10 : vector<16x1xf32>
    %12 = vector.broadcast %11 : vector<16x1xf32> to vector<16x32xf32>
    %13 = arith.subf %3, %12 : vector<16x32xf32>
    %14 = arith.mulf %13, %13 : vector<16x32xf32>
    %cst_9 = arith.constant dense<0.000000e+00> : vector<16xf32>
    %15 = vector.multi_reduction <add>, %14, %cst_9 [1] : vector<16x32xf32> to vector<16xf32>
    %16 = vector.shape_cast %15 : vector<16xf32> to vector<16x1xf32>
    %cst_10 = arith.constant 3.200000e+01 : f32
    %17 = vector.broadcast %cst_10 : f32 to vector<16x1xf32>
    %18 = arith.divf %16, %17 : vector<16x1xf32>
    %19 = vector.broadcast %11 : vector<16x1xf32> to vector<16x32xf32>
    %20 = arith.subf %3, %19 : vector<16x32xf32>
    %cst_11 = arith.constant 9.99999974E-6 : f32
    %21 = vector.broadcast %cst_11 : f32 to vector<16x1xf32>
    %22 = arith.addf %18, %21 : vector<16x1xf32>
    %23 = math.rsqrt %22 : vector<16x1xf32>
    %24 = vector.broadcast %23 : vector<16x1xf32> to vector<16x32xf32>
    %25 = arith.mulf %20, %24 : vector<16x32xf32>
    %26 = vector.broadcast %5 : vector<1x32xf32> to vector<16x32xf32>
    %27 = arith.mulf %25, %26 : vector<16x32xf32>
    %28 = vector.broadcast %7 : vector<1x32xf32> to vector<16x32xf32>
    %29 = arith.addf %27, %28 : vector<16x32xf32>
    %c0_12 = arith.constant 0 : index
    %c0_13 = arith.constant 0 : index
    %c0_14 = arith.constant 0 : index
    %30 = vector.load %arg6[%c0_12, %c0_13, %c0_14] : memref<1x32x96xf32, #tpu.memory_space<vmem>>, vector<1x32x96xf32>
    %31 = vector.shape_cast %30 : vector<1x32x96xf32> to vector<32x96xf32>
    %cst_15 = arith.constant dense<0.000000e+00> : vector<16x96xf32>
    %32 = tpu.matmul %29, %31, %cst_15 {dimension_numbers = #tpu.dot_dimension_numbers<[1], [0], [0], [1], [0, 0, 1, 1], [], []>} : vector<16x32xf32>, vector<32x96xf32>, vector<16x96xf32> -> vector<16x96xf32>
    %c0_16 = arith.constant 0 : index
    %c0_17 = arith.constant 0 : index
    %c0_18 = arith.constant 0 : index
    %33 = vector.load %arg7[%c0_16, %c0_17, %c0_18] : memref<1x1x96xf32, #tpu.memory_space<vmem>>, vector<1x1x96xf32>
    %34 = vector.shape_cast %33 : vector<1x1x96xf32> to vector<1x96xf32>
    %35 = vector.broadcast %34 : vector<1x96xf32> to vector<16x96xf32>
    %36 = arith.addf %32, %35 : vector<16x96xf32>
    %37 = vector.shape_cast %36 : vector<16x96xf32> to vector<2x8x96xf32>
    %38 = vector.extract_strided_slice %37 {offsets = [0, 0, 0], sizes = [2, 8, 32], strides = [1, 1, 1]} : vector<2x8x96xf32> to vector<2x8x32xf32>
    %39 = vector.extract_strided_slice %37 {offsets = [0, 0, 32], sizes = [2, 8, 32], strides = [1, 1, 1]} : vector<2x8x96xf32> to vector<2x8x32xf32>
    %40 = vector.extract_strided_slice %37 {offsets = [0, 0, 64], sizes = [2, 8, 32], strides = [1, 1, 1]} : vector<2x8x96xf32> to vector<2x8x32xf32>
    %c0_19 = arith.constant 0 : index
    %c0_20 = arith.constant 0 : index
    %41 = vector.load %arg2[%c0_19, %c0_20] : memref<8x8xf32, #tpu.memory_space<vmem>>, vector<8x8xf32>
    %42 = vector.extract_strided_slice %38 {offsets = [0, 0, 0], sizes = [2, 8, 8], strides = [1, 1, 1]} : vector<2x8x32xf32> to vector<2x8x8xf32>
    %43 = vector.extract_strided_slice %39 {offsets = [0, 0, 0], sizes = [2, 8, 8], strides = [1, 1, 1]} : vector<2x8x32xf32> to vector<2x8x8xf32>
    %44 = vector.extract_strided_slice %40 {offsets = [0, 0, 0], sizes = [2, 8, 8], strides = [1, 1, 1]} : vector<2x8x32xf32> to vector<2x8x8xf32>
    "tpu.trace_start"() <{level = 10 : i32, message = "bqd,bkd->bqk"}> : () -> ()
    %cst_21 = arith.constant dense<0.000000e+00> : vector<2x8x8xf32>
    %45 = tpu.matmul %42, %43, %cst_21 {dimension_numbers = #tpu.dot_dimension_numbers<[2], [2], [1], [1], [0, 0, 0, 1, 1, 1], [0], [0]>} : vector<2x8x8xf32>, vector<2x8x8xf32>, vector<2x8x8xf32> -> vector<2x8x8xf32>
    "tpu.trace_stop"() : () -> ()
    %cst_22 = arith.constant 0.353553385 : f32
    %46 = vector.broadcast %cst_22 : f32 to vector<2x8x8xf32>
    %47 = arith.mulf %45, %46 : vector<2x8x8xf32>
    %48 = vector.shape_cast %41 : vector<8x8xf32> to vector<1x8x8xf32>
    %49 = vector.broadcast %48 : vector<1x8x8xf32> to vector<2x8x8xf32>
    %50 = arith.addf %47, %49 : vector<2x8x8xf32>
    %cst_23 = arith.constant dense<0xFF800000> : vector<2x8xf32>
    %51 = vector.multi_reduction <maximumf>, %50, %cst_23 [2] : vector<2x8x8xf32> to vector<2x8xf32>
    %52 = vector.shape_cast %51 : vector<2x8xf32> to vector<2x8x1xf32>
    %53 = vector.broadcast %52 : vector<2x8x1xf32> to vector<2x8x8xf32>
    %54 = arith.subf %50, %53 : vector<2x8x8xf32>
    %55 = math.exp %54 : vector<2x8x8xf32>
    %cst_24 = arith.constant dense<0.000000e+00> : vector<2x8xf32>
    %56 = vector.multi_reduction <add>, %55, %cst_24 [2] : vector<2x8x8xf32> to vector<2x8xf32>
    %57 = vector.shape_cast %56 : vector<2x8xf32> to vector<2x8x1xf32>
    %58 = tpu.reciprocal %57 {approx = true} : vector<2x8x1xf32> -> vector<2x8x1xf32>
    %59 = vector.broadcast %58 : vector<2x8x1xf32> to vector<2x8x8xf32>
    %60 = arith.mulf %55, %59 : vector<2x8x8xf32>
    "tpu.trace_start"() <{level = 10 : i32, message = "bqk,bkd->bqd"}> : () -> ()
    %cst_25 = arith.constant dense<0.000000e+00> : vector<2x8x8xf32>
    %61 = tpu.matmul %60, %44, %cst_25 {dimension_numbers = #tpu.dot_dimension_numbers<[2], [1], [1], [2], [0, 0, 0, 1, 1, 2], [0], [0]>} : vector<2x8x8xf32>, vector<2x8x8xf32>, vector<2x8x8xf32> -> vector<2x8x8xf32>
    "tpu.trace_stop"() : () -> ()
    %62 = vector.extract_strided_slice %38 {offsets = [0, 0, 8], sizes = [2, 8, 8], strides = [1, 1, 1]} : vector<2x8x32xf32> to vector<2x8x8xf32>
    %63 = vector.extract_strided_slice %39 {offsets = [0, 0, 8], sizes = [2, 8, 8], strides = [1, 1, 1]} : vector<2x8x32xf32> to vector<2x8x8xf32>
    %64 = vector.extract_strided_slice %40 {offsets = [0, 0, 8], sizes = [2, 8, 8], strides = [1, 1, 1]} : vector<2x8x32xf32> to vector<2x8x8xf32>
    "tpu.trace_start"() <{level = 10 : i32, message = "bqd,bkd->bqk"}> : () -> ()
    %cst_26 = arith.constant dense<0.000000e+00> : vector<2x8x8xf32>
    %65 = tpu.matmul %62, %63, %cst_26 {dimension_numbers = #tpu.dot_dimension_numbers<[2], [2], [1], [1], [0, 0, 0, 1, 1, 1], [0], [0]>} : vector<2x8x8xf32>, vector<2x8x8xf32>, vector<2x8x8xf32> -> vector<2x8x8xf32>
    "tpu.trace_stop"() : () -> ()
    %cst_27 = arith.constant 0.353553385 : f32
    %66 = vector.broadcast %cst_27 : f32 to vector<2x8x8xf32>
    %67 = arith.mulf %65, %66 : vector<2x8x8xf32>
    %68 = vector.shape_cast %41 : vector<8x8xf32> to vector<1x8x8xf32>
    %69 = vector.broadcast %68 : vector<1x8x8xf32> to vector<2x8x8xf32>
    %70 = arith.addf %67, %69 : vector<2x8x8xf32>
    %cst_28 = arith.constant dense<0xFF800000> : vector<2x8xf32>
    %71 = vector.multi_reduction <maximumf>, %70, %cst_28 [2] : vector<2x8x8xf32> to vector<2x8xf32>
    %72 = vector.shape_cast %71 : vector<2x8xf32> to vector<2x8x1xf32>
    %73 = vector.broadcast %72 : vector<2x8x1xf32> to vector<2x8x8xf32>
    %74 = arith.subf %70, %73 : vector<2x8x8xf32>
    %75 = math.exp %74 : vector<2x8x8xf32>
    %cst_29 = arith.constant dense<0.000000e+00> : vector<2x8xf32>
    %76 = vector.multi_reduction <add>, %75, %cst_29 [2] : vector<2x8x8xf32> to vector<2x8xf32>
    %77 = vector.shape_cast %76 : vector<2x8xf32> to vector<2x8x1xf32>
    %78 = tpu.reciprocal %77 {approx = true} : vector<2x8x1xf32> -> vector<2x8x1xf32>
    %79 = vector.broadcast %78 : vector<2x8x1xf32> to vector<2x8x8xf32>
    %80 = arith.mulf %75, %79 : vector<2x8x8xf32>
    "tpu.trace_start"() <{level = 10 : i32, message = "bqk,bkd->bqd"}> : () -> ()
    %cst_30 = arith.constant dense<0.000000e+00> : vector<2x8x8xf32>
    %81 = tpu.matmul %80, %64, %cst_30 {dimension_numbers = #tpu.dot_dimension_numbers<[2], [1], [1], [2], [0, 0, 0, 1, 1, 2], [0], [0]>} : vector<2x8x8xf32>, vector<2x8x8xf32>, vector<2x8x8xf32> -> vector<2x8x8xf32>
    "tpu.trace_stop"() : () -> ()
    %82 = vector.extract_strided_slice %38 {offsets = [0, 0, 16], sizes = [2, 8, 8], strides = [1, 1, 1]} : vector<2x8x32xf32> to vector<2x8x8xf32>
    %83 = vector.extract_strided_slice %39 {offsets = [0, 0, 16], sizes = [2, 8, 8], strides = [1, 1, 1]} : vector<2x8x32xf32> to vector<2x8x8xf32>
    %84 = vector.extract_strided_slice %40 {offsets = [0, 0, 16], sizes = [2, 8, 8], strides = [1, 1, 1]} : vector<2x8x32xf32> to vector<2x8x8xf32>
    "tpu.trace_start"() <{level = 10 : i32, message = "bqd,bkd->bqk"}> : () -> ()
    %cst_31 = arith.constant dense<0.000000e+00> : vector<2x8x8xf32>
    %85 = tpu.matmul %82, %83, %cst_31 {dimension_numbers = #tpu.dot_dimension_numbers<[2], [2], [1], [1], [0, 0, 0, 1, 1, 1], [0], [0]>} : vector<2x8x8xf32>, vector<2x8x8xf32>, vector<2x8x8xf32> -> vector<2x8x8xf32>
    "tpu.trace_stop"() : () -> ()
    %cst_32 = arith.constant 0.353553385 : f32
    %86 = vector.broadcast %cst_32 : f32 to vector<2x8x8xf32>
    %87 = arith.mulf %85, %86 : vector<2x8x8xf32>
    %88 = vector.shape_cast %41 : vector<8x8xf32> to vector<1x8x8xf32>
    %89 = vector.broadcast %88 : vector<1x8x8xf32> to vector<2x8x8xf32>
    %90 = arith.addf %87, %89 : vector<2x8x8xf32>
    %cst_33 = arith.constant dense<0xFF800000> : vector<2x8xf32>
    %91 = vector.multi_reduction <maximumf>, %90, %cst_33 [2] : vector<2x8x8xf32> to vector<2x8xf32>
    %92 = vector.shape_cast %91 : vector<2x8xf32> to vector<2x8x1xf32>
    %93 = vector.broadcast %92 : vector<2x8x1xf32> to vector<2x8x8xf32>
    %94 = arith.subf %90, %93 : vector<2x8x8xf32>
    %95 = math.exp %94 : vector<2x8x8xf32>
    %cst_34 = arith.constant dense<0.000000e+00> : vector<2x8xf32>
    %96 = vector.multi_reduction <add>, %95, %cst_34 [2] : vector<2x8x8xf32> to vector<2x8xf32>
    %97 = vector.shape_cast %96 : vector<2x8xf32> to vector<2x8x1xf32>
    %98 = tpu.reciprocal %97 {approx = true} : vector<2x8x1xf32> -> vector<2x8x1xf32>
    %99 = vector.broadcast %98 : vector<2x8x1xf32> to vector<2x8x8xf32>
    %100 = arith.mulf %95, %99 : vector<2x8x8xf32>
    "tpu.trace_start"() <{level = 10 : i32, message = "bqk,bkd->bqd"}> : () -> ()
    %cst_35 = arith.constant dense<0.000000e+00> : vector<2x8x8xf32>
    %101 = tpu.matmul %100, %84, %cst_35 {dimension_numbers = #tpu.dot_dimension_numbers<[2], [1], [1], [2], [0, 0, 0, 1, 1, 2], [0], [0]>} : vector<2x8x8xf32>, vector<2x8x8xf32>, vector<2x8x8xf32> -> vector<2x8x8xf32>
    "tpu.trace_stop"() : () -> ()
    %102 = vector.extract_strided_slice %38 {offsets = [0, 0, 24], sizes = [2, 8, 8], strides = [1, 1, 1]} : vector<2x8x32xf32> to vector<2x8x8xf32>
    %103 = vector.extract_strided_slice %39 {offsets = [0, 0, 24], sizes = [2, 8, 8], strides = [1, 1, 1]} : vector<2x8x32xf32> to vector<2x8x8xf32>
    %104 = vector.extract_strided_slice %40 {offsets = [0, 0, 24], sizes = [2, 8, 8], strides = [1, 1, 1]} : vector<2x8x32xf32> to vector<2x8x8xf32>
    "tpu.trace_start"() <{level = 10 : i32, message = "bqd,bkd->bqk"}> : () -> ()
    %cst_36 = arith.constant dense<0.000000e+00> : vector<2x8x8xf32>
    %105 = tpu.matmul %102, %103, %cst_36 {dimension_numbers = #tpu.dot_dimension_numbers<[2], [2], [1], [1], [0, 0, 0, 1, 1, 1], [0], [0]>} : vector<2x8x8xf32>, vector<2x8x8xf32>, vector<2x8x8xf32> -> vector<2x8x8xf32>
    "tpu.trace_stop"() : () -> ()
    %cst_37 = arith.constant 0.353553385 : f32
    %106 = vector.broadcast %cst_37 : f32 to vector<2x8x8xf32>
    %107 = arith.mulf %105, %106 : vector<2x8x8xf32>
    %108 = vector.shape_cast %41 : vector<8x8xf32> to vector<1x8x8xf32>
    %109 = vector.broadcast %108 : vector<1x8x8xf32> to vector<2x8x8xf32>
    %110 = arith.addf %107, %109 : vector<2x8x8xf32>
    %cst_38 = arith.constant dense<0xFF800000> : vector<2x8xf32>
    %111 = vector.multi_reduction <maximumf>, %110, %cst_38 [2] : vector<2x8x8xf32> to vector<2x8xf32>
    %112 = vector.shape_cast %111 : vector<2x8xf32> to vector<2x8x1xf32>
    %113 = vector.broadcast %112 : vector<2x8x1xf32> to vector<2x8x8xf32>
    %114 = arith.subf %110, %113 : vector<2x8x8xf32>
    %115 = math.exp %114 : vector<2x8x8xf32>
    %cst_39 = arith.constant dense<0.000000e+00> : vector<2x8xf32>
    %116 = vector.multi_reduction <add>, %115, %cst_39 [2] : vector<2x8x8xf32> to vector<2x8xf32>
    %117 = vector.shape_cast %116 : vector<2x8xf32> to vector<2x8x1xf32>
    %118 = tpu.reciprocal %117 {approx = true} : vector<2x8x1xf32> -> vector<2x8x1xf32>
    %119 = vector.broadcast %118 : vector<2x8x1xf32> to vector<2x8x8xf32>
    %120 = arith.mulf %115, %119 : vector<2x8x8xf32>
    "tpu.trace_start"() <{level = 10 : i32, message = "bqk,bkd->bqd"}> : () -> ()
    %cst_40 = arith.constant dense<0.000000e+00> : vector<2x8x8xf32>
    %121 = tpu.matmul %120, %104, %cst_40 {dimension_numbers = #tpu.dot_dimension_numbers<[2], [1], [1], [2], [0, 0, 0, 1, 1, 2], [0], [0]>} : vector<2x8x8xf32>, vector<2x8x8xf32>, vector<2x8x8xf32> -> vector<2x8x8xf32>
    "tpu.trace_stop"() : () -> ()
    %122 = tpu.concatenate %61, %81, %101, %121 in 2 : vector<2x8x8xf32>, vector<2x8x8xf32>, vector<2x8x8xf32>, vector<2x8x8xf32> -> vector<2x8x32xf32>
    %123 = vector.shape_cast %122 : vector<2x8x32xf32> to vector<16x32xf32>
    %c0_41 = arith.constant 0 : index
    %c0_42 = arith.constant 0 : index
    %c0_43 = arith.constant 0 : index
    %124 = vector.load %arg8[%c0_41, %c0_42, %c0_43] : memref<1x32x32xf32, #tpu.memory_space<vmem>>, vector<1x32x32xf32>
    %125 = vector.shape_cast %124 : vector<1x32x32xf32> to vector<32x32xf32>
    %cst_44 = arith.constant dense<0.000000e+00> : vector<16x32xf32>
    %126 = tpu.matmul %123, %125, %cst_44 {dimension_numbers = #tpu.dot_dimension_numbers<[1], [0], [0], [1], [0, 0, 1, 1], [], []>} : vector<16x32xf32>, vector<32x32xf32>, vector<16x32xf32> -> vector<16x32xf32>
    %c0_45 = arith.constant 0 : index
    %c0_46 = arith.constant 0 : index
    %c0_47 = arith.constant 0 : index
    %127 = vector.load %arg9[%c0_45, %c0_46, %c0_47] : memref<1x1x32xf32, #tpu.memory_space<vmem>>, vector<1x1x32xf32>
    %128 = vector.shape_cast %127 : vector<1x1x32xf32> to vector<1x32xf32>
    %129 = vector.broadcast %128 : vector<1x32xf32> to vector<16x32xf32>
    %130 = arith.addf %126, %129 : vector<16x32xf32>
    %131 = arith.addf %3, %130 : vector<16x32xf32>
    %c0_48 = arith.constant 0 : index
    %c0_49 = arith.constant 0 : index
    %c0_50 = arith.constant 0 : index
    %132 = vector.load %arg10[%c0_48, %c0_49, %c0_50] : memref<1x1x32xf32, #tpu.memory_space<vmem>>, vector<1x1x32xf32>
    %133 = vector.shape_cast %132 : vector<1x1x32xf32> to vector<1x32xf32>
    %c0_51 = arith.constant 0 : index
    %c0_52 = arith.constant 0 : index
    %c0_53 = arith.constant 0 : index
    %134 = vector.load %arg11[%c0_51, %c0_52, %c0_53] : memref<1x1x32xf32, #tpu.memory_space<vmem>>, vector<1x1x32xf32>
    %135 = vector.shape_cast %134 : vector<1x1x32xf32> to vector<1x32xf32>
    %cst_54 = arith.constant dense<0.000000e+00> : vector<16xf32>
    %136 = vector.multi_reduction <add>, %131, %cst_54 [1] : vector<16x32xf32> to vector<16xf32>
    %137 = vector.shape_cast %136 : vector<16xf32> to vector<16x1xf32>
    %cst_55 = arith.constant 3.200000e+01 : f32
    %138 = vector.broadcast %cst_55 : f32 to vector<16x1xf32>
    %139 = arith.divf %137, %138 : vector<16x1xf32>
    %140 = vector.broadcast %139 : vector<16x1xf32> to vector<16x32xf32>
    %141 = arith.subf %131, %140 : vector<16x32xf32>
    %142 = arith.mulf %141, %141 : vector<16x32xf32>
    %cst_56 = arith.constant dense<0.000000e+00> : vector<16xf32>
    %143 = vector.multi_reduction <add>, %142, %cst_56 [1] : vector<16x32xf32> to vector<16xf32>
    %144 = vector.shape_cast %143 : vector<16xf32> to vector<16x1xf32>
    %cst_57 = arith.constant 3.200000e+01 : f32
    %145 = vector.broadcast %cst_57 : f32 to vector<16x1xf32>
    %146 = arith.divf %144, %145 : vector<16x1xf32>
    %147 = vector.broadcast %139 : vector<16x1xf32> to vector<16x32xf32>
    %148 = arith.subf %131, %147 : vector<16x32xf32>
    %cst_58 = arith.constant 9.99999974E-6 : f32
    %149 = vector.broadcast %cst_58 : f32 to vector<16x1xf32>
    %150 = arith.addf %146, %149 : vector<16x1xf32>
    %151 = math.rsqrt %150 : vector<16x1xf32>
    %152 = vector.broadcast %151 : vector<16x1xf32> to vector<16x32xf32>
    %153 = arith.mulf %148, %152 : vector<16x32xf32>
    %154 = vector.broadcast %133 : vector<1x32xf32> to vector<16x32xf32>
    %155 = arith.mulf %153, %154 : vector<16x32xf32>
    %156 = vector.broadcast %135 : vector<1x32xf32> to vector<16x32xf32>
    %157 = arith.addf %155, %156 : vector<16x32xf32>
    %c0_59 = arith.constant 0 : index
    %c0_60 = arith.constant 0 : index
    %c0_61 = arith.constant 0 : index
    %158 = vector.load %arg12[%c0_59, %c0_60, %c0_61] : memref<1x32x128xf32, #tpu.memory_space<vmem>>, vector<1x32x128xf32>
    %159 = vector.shape_cast %158 : vector<1x32x128xf32> to vector<32x128xf32>
    %cst_62 = arith.constant dense<0.000000e+00> : vector<16x128xf32>
    %160 = tpu.matmul %157, %159, %cst_62 {dimension_numbers = #tpu.dot_dimension_numbers<[1], [0], [0], [1], [0, 0, 1, 1], [], []>} : vector<16x32xf32>, vector<32x128xf32>, vector<16x128xf32> -> vector<16x128xf32>
    %c0_63 = arith.constant 0 : index
    %c0_64 = arith.constant 0 : index
    %c0_65 = arith.constant 0 : index
    %161 = vector.load %arg13[%c0_63, %c0_64, %c0_65] : memref<1x1x128xf32, #tpu.memory_space<vmem>>, vector<1x1x128xf32>
    %162 = vector.shape_cast %161 : vector<1x1x128xf32> to vector<1x128xf32>
    %163 = vector.broadcast %162 : vector<1x128xf32> to vector<16x128xf32>
    %164 = arith.addf %160, %163 : vector<16x128xf32>
    %cst_66 = arith.constant 1.702000e+00 : f32
    %165 = vector.broadcast %cst_66 : f32 to vector<16x128xf32>
    %166 = arith.mulf %165, %164 : vector<16x128xf32>
    %167 = arith.negf %166 : vector<16x128xf32>
    %168 = math.exp %167 : vector<16x128xf32>
    %cst_67 = arith.constant 1.000000e+00 : f32
    %169 = vector.broadcast %cst_67 : f32 to vector<16x128xf32>
    %170 = arith.addf %169, %168 : vector<16x128xf32>
    %171 = arith.divf %169, %170 : vector<16x128xf32>
    %172 = arith.mulf %164, %171 : vector<16x128xf32>
    %c0_68 = arith.constant 0 : index
    %c0_69 = arith.constant 0 : index
    %c0_70 = arith.constant 0 : index
    %173 = vector.load %arg14[%c0_68, %c0_69, %c0_70] : memref<1x128x32xf32, #tpu.memory_space<vmem>>, vector<1x128x32xf32>
    %174 = vector.shape_cast %173 : vector<1x128x32xf32> to vector<128x32xf32>
    %cst_71 = arith.constant dense<0.000000e+00> : vector<16x32xf32>
    %175 = tpu.matmul %172, %174, %cst_71 {dimension_numbers = #tpu.dot_dimension_numbers<[1], [0], [0], [1], [0, 0, 1, 1], [], []>} : vector<16x128xf32>, vector<128x32xf32>, vector<16x32xf32> -> vector<16x32xf32>
    %c0_72 = arith.constant 0 : index
    %c0_73 = arith.constant 0 : index
    %c0_74 = arith.constant 0 : index
    %176 = vector.load %arg15[%c0_72, %c0_73, %c0_74] : memref<1x1x32xf32, #tpu.memory_space<vmem>>, vector<1x1x32xf32>
    %177 = vector.shape_cast %176 : vector<1x1x32xf32> to vector<1x32xf32>
    %178 = vector.broadcast %177 : vector<1x32xf32> to vector<16x32xf32>
    %179 = arith.addf %175, %178 : vector<16x32xf32>
    %180 = arith.addf %131, %179 : vector<16x32xf32>
    %c0_75 = arith.constant 0 : index
    %c0_76 = arith.constant 0 : index
    %181 = vector.load %arg20[%c0_75, %c0_76] : memref<16x32xf32, #tpu.memory_space<vmem>>, vector<16x32xf32>
    tpu.vector_store %arg20[%c0_75, %c0_76], %180 {strides = array<i32>} : memref<16x32xf32, #tpu.memory_space<vmem>>, vector<16x32xf32>,
    %c1_i32 = arith.constant 1 : i32
    %182 = arith.cmpi eq, %arg0, %c1_i32 : i32
    %183 = arith.extui %182 : i1 to i32
    %c0_i32_77 = arith.constant 0 : i32
    %184 = arith.cmpi ne, %183, %c0_i32_77 : i32
    scf.if %184 {
      %c0_78 = arith.constant 0 : index
      %c0_79 = arith.constant 0 : index
      %185 = vector.load %arg3[%c0_78, %c0_79] : memref<2x16xf32, #tpu.memory_space<vmem>>, vector<2x16xf32>
      %cst_80 = arith.constant dense<0.000000e+00> : vector<2x32xf32>
      %186 = tpu.matmul %185, %180, %cst_80 {dimension_numbers = #tpu.dot_dimension_numbers<[1], [0], [0], [1], [0, 0, 1, 1], [], []>} : vector<2x16xf32>, vector<16x32xf32>, vector<2x32xf32> -> vector<2x32xf32>
      %c0_81 = arith.constant 0 : index
      %c0_82 = arith.constant 0 : index
      %187 = vector.load %arg16[%c0_81, %c0_82] : memref<1x32xf32, #tpu.memory_space<vmem>>, vector<1x32xf32>
      %c0_83 = arith.constant 0 : index
      %c0_84 = arith.constant 0 : index
      %188 = vector.load %arg17[%c0_83, %c0_84] : memref<1x32xf32, #tpu.memory_space<vmem>>, vector<1x32xf32>
      %cst_85 = arith.constant dense<0.000000e+00> : vector<2xf32>
      %189 = vector.multi_reduction <add>, %186, %cst_85 [1] : vector<2x32xf32> to vector<2xf32>
      %190 = vector.shape_cast %189 : vector<2xf32> to vector<2x1xf32>
      %cst_86 = arith.constant 3.200000e+01 : f32
      %191 = vector.broadcast %cst_86 : f32 to vector<2x1xf32>
      %192 = arith.divf %190, %191 : vector<2x1xf32>
      %193 = vector.broadcast %192 : vector<2x1xf32> to vector<2x32xf32>
      %194 = arith.subf %186, %193 : vector<2x32xf32>
      %195 = arith.mulf %194, %194 : vector<2x32xf32>
      %cst_87 = arith.constant dense<0.000000e+00> : vector<2xf32>
      %196 = vector.multi_reduction <add>, %195, %cst_87 [1] : vector<2x32xf32> to vector<2xf32>
      %197 = vector.shape_cast %196 : vector<2xf32> to vector<2x1xf32>
      %cst_88 = arith.constant 3.200000e+01 : f32
      %198 = vector.broadcast %cst_88 : f32 to vector<2x1xf32>
      %199 = arith.divf %197, %198 : vector<2x1xf32>
      %200 = vector.broadcast %192 : vector<2x1xf32> to vector<2x32xf32>
      %201 = arith.subf %186, %200 : vector<2x32xf32>
      %cst_89 = arith.constant 9.99999974E-6 : f32
      %202 = vector.broadcast %cst_89 : f32 to vector<2x1xf32>
      %203 = arith.addf %199, %202 : vector<2x1xf32>
      %204 = math.rsqrt %203 : vector<2x1xf32>
      %205 = vector.broadcast %204 : vector<2x1xf32> to vector<2x32xf32>
      %206 = arith.mulf %201, %205 : vector<2x32xf32>
      %207 = vector.broadcast %187 : vector<1x32xf32> to vector<2x32xf32>
      %208 = arith.mulf %206, %207 : vector<2x32xf32>
      %209 = vector.broadcast %188 : vector<1x32xf32> to vector<2x32xf32>
      %210 = arith.addf %208, %209 : vector<2x32xf32>
      %c0_90 = arith.constant 0 : index
      %c0_91 = arith.constant 0 : index
      %211 = vector.load %arg18[%c0_90, %c0_91] : memref<32x32xf32, #tpu.memory_space<vmem>>, vector<32x32xf32>
      %cst_92 = arith.constant dense<0.000000e+00> : vector<2x32xf32>
      %212 = tpu.matmul %210, %211, %cst_92 {dimension_numbers = #tpu.dot_dimension_numbers<[1], [0], [0], [1], [0, 0, 1, 1], [], []>} : vector<2x32xf32>, vector<32x32xf32>, vector<2x32xf32> -> vector<2x32xf32>
      %213 = arith.mulf %212, %212 : vector<2x32xf32>
      %cst_93 = arith.constant dense<0.000000e+00> : vector<2xf32>
      %214 = vector.multi_reduction <add>, %213, %cst_93 [1] : vector<2x32xf32> to vector<2xf32>
      %215 = vector.shape_cast %214 : vector<2xf32> to vector<2x1xf32>
      %cst_94 = arith.constant 9.99999996E-13 : f32
      %216 = vector.broadcast %cst_94 : f32 to vector<2x1xf32>
      %217 = arith.maximumf %215, %216 : vector<2x1xf32>
      %218 = math.rsqrt %217 : vector<2x1xf32>
      %219 = vector.broadcast %218 : vector<2x1xf32> to vector<2x32xf32>
      %220 = arith.mulf %212, %219 : vector<2x32xf32>
      %c0_95 = arith.constant 0 : index
      %c0_96 = arith.constant 0 : index
      %221 = vector.load %arg19[%c0_95, %c0_96] : memref<2x32xf32, #tpu.memory_space<vmem>>, vector<2x32xf32>
      tpu.vector_store %arg19[%c0_95, %c0_96], %220 {strides = array<i32>} : memref<2x32xf32, #tpu.memory_space<vmem>>, vector<2x32xf32>,
    } else {
    }
    return
  }
  func.func @transform_0(%arg0: i32) -> (i32, i32) {
    %c0_i32 = arith.constant 0 : i32
    %c0_i32_0 = arith.constant 0 : i32
    %c0_i32_1 = arith.constant 0 : i32
    return %c0_i32, %c0_i32_0 : i32, i32
  }
  func.func @transform_1(%arg0: i32) -> (i32, i32) {
    %c0_i32 = arith.constant 0 : i32
    %c0_i32_0 = arith.constant 0 : i32
    %c0_i32_1 = arith.constant 0 : i32
    return %c0_i32, %c0_i32_0 : i32, i32
  }
  func.func @transform_2(%arg0: i32) -> (i32, i32) {
    %c0_i32 = arith.constant 0 : i32
    %c0_i32_0 = arith.constant 0 : i32
    %c0_i32_1 = arith.constant 0 : i32
    return %c0_i32, %c0_i32_0 : i32, i32
  }
  func.func @transform_3(%arg0: i32) -> (i32, i32, i32) {
    %c0_i32 = arith.constant 0 : i32
    %c0_i32_0 = arith.constant 0 : i32
    %c0_i32_1 = arith.constant 0 : i32
    return %arg0, %c0_i32, %c0_i32_0 : i32, i32, i32
  }
  func.func @transform_4(%arg0: i32) -> (i32, i32, i32) {
    %c0_i32 = arith.constant 0 : i32
    %c0_i32_0 = arith.constant 0 : i32
    %c0_i32_1 = arith.constant 0 : i32
    return %arg0, %c0_i32, %c0_i32_0 : i32, i32, i32
  }
  func.func @transform_5(%arg0: i32) -> (i32, i32, i32) {
    %c0_i32 = arith.constant 0 : i32
    %c0_i32_0 = arith.constant 0 : i32
    %c0_i32_1 = arith.constant 0 : i32
    return %arg0, %c0_i32, %c0_i32_0 : i32, i32, i32
  }
  func.func @transform_6(%arg0: i32) -> (i32, i32, i32) {
    %c0_i32 = arith.constant 0 : i32
    %c0_i32_0 = arith.constant 0 : i32
    %c0_i32_1 = arith.constant 0 : i32
    return %arg0, %c0_i32, %c0_i32_0 : i32, i32, i32
  }
  func.func @transform_7(%arg0: i32) -> (i32, i32, i32) {
    %c0_i32 = arith.constant 0 : i32
    %c0_i32_0 = arith.constant 0 : i32
    %c0_i32_1 = arith.constant 0 : i32
    return %arg0, %c0_i32, %c0_i32_0 : i32, i32, i32
  }
  func.func @transform_8(%arg0: i32) -> (i32, i32, i32) {
    %c0_i32 = arith.constant 0 : i32
    %c0_i32_0 = arith.constant 0 : i32
    %c0_i32_1 = arith.constant 0 : i32
    return %arg0, %c0_i32, %c0_i32_0 : i32, i32, i32
  }
  func.func @transform_9(%arg0: i32) -> (i32, i32, i32) {
    %c0_i32 = arith.constant 0 : i32
    %c0_i32_0 = arith.constant 0 : i32
    %c0_i32_1 = arith.constant 0 : i32
    return %arg0, %c0_i32, %c0_i32_0 : i32, i32, i32
  }
  func.func @transform_10(%arg0: i32) -> (i32, i32, i32) {
    %c0_i32 = arith.constant 0 : i32
    %c0_i32_0 = arith.constant 0 : i32
    %c0_i32_1 = arith.constant 0 : i32
    return %arg0, %c0_i32, %c0_i32_0 : i32, i32, i32
  }
  func.func @transform_11(%arg0: i32) -> (i32, i32, i32) {
    %c0_i32 = arith.constant 0 : i32
    %c0_i32_0 = arith.constant 0 : i32
    %c0_i32_1 = arith.constant 0 : i32
    return %arg0, %c0_i32, %c0_i32_0 : i32, i32, i32
  }
  func.func @transform_12(%arg0: i32) -> (i32, i32, i32) {
    %c0_i32 = arith.constant 0 : i32
    %c0_i32_0 = arith.constant 0 : i32
    %c0_i32_1 = arith.constant 0 : i32
    return %arg0, %c0_i32, %c0_i32_0 : i32, i32, i32
  }
  func.func @transform_13(%arg0: i32) -> (i32, i32, i32) {
    %c0_i32 = arith.constant 0 : i32
    %c0_i32_0 = arith.constant 0 : i32
    %c0_i32_1 = arith.constant 0 : i32
    return %arg0, %c0_i32, %c0_i32_0 : i32, i32, i32
  }
  func.func @transform_14(%arg0: i32) -> (i32, i32, i32) {
    %c0_i32 = arith.constant 0 : i32
    %c0_i32_0 = arith.constant 0 : i32
    %c0_i32_1 = arith.constant 0 : i32
    return %arg0, %c0_i32, %c0_i32_0 : i32, i32, i32
  }
  func.func @transform_15(%arg0: i32) -> (i32, i32) {
    %c0_i32 = arith.constant 0 : i32
    %c0_i32_0 = arith.constant 0 : i32
    %c0_i32_1 = arith.constant 0 : i32
    return %c0_i32, %c0_i32_0 : i32, i32
  }
  func.func @transform_16(%arg0: i32) -> (i32, i32) {
    %c0_i32 = arith.constant 0 : i32
    %c0_i32_0 = arith.constant 0 : i32
    %c0_i32_1 = arith.constant 0 : i32
    return %c0_i32, %c0_i32_0 : i32, i32
  }
  func.func @transform_17(%arg0: i32) -> (i32, i32) {
    %c0_i32 = arith.constant 0 : i32
    %c0_i32_0 = arith.constant 0 : i32
    %c0_i32_1 = arith.constant 0 : i32
    return %c0_i32, %c0_i32_0 : i32, i32
  }
  func.func @transform_18(%arg0: i32) -> (i32, i32) {
    %c0_i32 = arith.constant 0 : i32
    %c0_i32_0 = arith.constant 0 : i32
    %c0_i32_1 = arith.constant 0 : i32
    return %c0_i32, %c0_i32_0 : i32, i32
  }
}

</mosaic_0001>

<bundles_post_ra>
// kernel: tpu_custom_call.1
= control target key start
LH: loop header
LB: loop body
LE: loop exit
PB: predicated region body
PF: predicated region fallthrough
CT: control target
= control target key end

     0   :  { %s3936_s0 = inlined_call_operand.vmem [shape: f32[16,32], index: 0, kind: input, shape index: {}]   ;;  %s3937_s1 = inlined_call_operand.vmem [shape: f32[8,8], index: 1, kind: input, shape index: {}]   ;;  %s3938_s2 = inlined_call_operand.vmem [shape: f32[2,16], index: 2, kind: input, shape index: {}]   ;;  %s3939_s3 = inlined_call_operand.vmem [shape: f32[2,1,32], index: 3, kind: input, shape index: {}]   ;;  %s3940_s4 = inlined_call_operand.vmem [shape: f32[2,1,32], index: 4, kind: input, shape index: {}]   ;;  %s3941_s5 = inlined_call_operand.vmem [shape: f32[2,32,96], index: 5, kind: input, shape index: {}]   ;;  %s3942_s6 = inlined_call_operand.vmem [shape: f32[2,1,96], index: 6, kind: input, shape index: {}]   ;;  %s3943_s7 = inlined_call_operand.vmem [shape: f32[2,32,32], index: 7, kind: input, shape index: {}]   ;;  %s3944_s8 = inlined_call_operand.vmem [shape: f32[2,1,32], index: 8, kind: input, shape index: {}]   ;;  %s3945_s9 = inlined_call_operand.vmem [shape: f32[2,1,32], index: 9, kind: input, shape index: {}]   ;;  %s3946_s10 = inlined_call_operand.vmem [shape: f32[2,1,32], index: 10, kind: input, shape index: {}]   ;;  %s3947_s11 = inlined_call_operand.vmem [shape: f32[2,32,128], index: 11, kind: input, shape index: {}]   ;;  %s3948_s12 = inlined_call_operand.vmem [shape: f32[2,1,128], index: 12, kind: input, shape index: {}]   ;;  %s3949_s13 = inlined_call_operand.vmem [shape: f32[2,128,32], index: 13, kind: input, shape index: {}]   ;;  %s3950_s14 = inlined_call_operand.vmem [shape: f32[2,1,32], index: 14, kind: input, shape index: {}]   ;;  %s3951_s15 = inlined_call_operand.vmem [shape: f32[1,32], index: 15, kind: input, shape index: {}]   ;;  %s3952_s16 = inlined_call_operand.vmem [shape: f32[1,32], index: 16, kind: input, shape index: {}]   ;;  %s3953_s17 = inlined_call_operand.vmem [shape: f32[32,32], index: 17, kind: input, shape index: {}]   ;;  %s3954_s18 = inlined_call_operand.hbm [shape: f32[2,32], index: 18, kind: output, shape index: {}]  }
   0x1   :  { %3959 = sst [smem:[#allocation7_spill]] %s3936_s0 }
   0x2   :  { %3960 = sst [smem:[#allocation8_spill]] %s3937_s1 }
   0x3   :  { %3961 = sst [smem:[#allocation9_spill]] %s3938_s2 }
   0x4   :  { %3962 = sst [smem:[#allocation10_spill]] %s3941_s5 }
   0x5   :  { %3963 = sst [smem:[#allocation11_spill]] %s3943_s7 }
   0x6   :  { %3964 = sst [smem:[#allocation12_spill]] %s3951_s15 }
   0x7   :  { %3965 = sst [smem:[#allocation13_spill]] %s3952_s16 }
   0x8   :  { %3966 = sst [smem:[#allocation14_spill]] %s3953_s17 }
   0x9   :  { %3967 = sst [smem:[#allocation15_spill]] %s3954_s18 }
   0xa   :  { %23 = vsyncpa [#allocation4], 0  ;;  %s3558_s27 = smov 0  }
   0xb LB: > { %3968 = sst [smem:[#allocation6_spill]] %s3441_s27  ;;  %s3564_s28 = sadd.s32 4294967295, %s3441_s27   ;;  %s3441_s27 = sphi %s3558_s27, %s29_s27  }
   0xc   : > { %p2949_p0 = scmp.ge.s32.totalorder %s3441_s27, 1  ;;  %p602_p1 = scmp.lt.s32.totalorder %s3441_s27, 3 }
   0xe   : > { %p603_p2 = pnand %p2949_p0, %p602_p1 }
   0xf   : > { %p690_p3 = scmp.lt.s32.totalorder (!%p603_p2), %s3564_s28, 1  ;;  %s3969_s5 = sld [smem:[#allocation10_spill]] (!%p603_p2) }
  0x10   : > { %606 = sbr.rel (%p603_p2) target bundleno = 5084 (0x13dc), region = 92  ;;  %s3970_s7 = sld [smem:[#allocation11_spill]] (!%p603_p2) }
  0x11   : > { %p2958_p4 = scmp.ne.s32.totalorder (!%p603_p2), %s3564_s28, 0 }
  0x17   : > { %s3570_s29 = scalar_select %p690_p3, %s3564_s28, 1 }
  0x18   : > { %737 = sbr.rel (%p2958_p4) target bundleno = 32 (0x20), region = 96  ;;  %s3971_s25 = sld [smem:[#allocation7_spill]] (!%p2958_p4)  ;;  %vm740_vm0 = vcmask (!%p2958_p4), 261120  }
  0x19   : > { %s3008_s22 = sshll.u32 %s3570_s29, 5  ;;  %s714_s15 = scalar_lea.vmem %s3945_s9, %s3570_s29 }
  0x1a   : > { %s3588_s30 = scalar_lea.vmem %s3969_s5, %s3008_s22  ;;  %s3593_s18 = scalar_lea.vmem %s3970_s7, %s3008_s22 }
  0x1b   : > { %s717_s24 = scalar_lea.vmem %s3946_s10, %s3570_s29  ;;  %s3610_s5 = scalar_lea.vmem %s3947_s11, %s3008_s22 }
  0x1c   : > { %s725_s7 = scalar_lea.vmem %s3948_s12, %s3570_s29  ;;  %s3011_s17 = sshll.u32 %s3570_s29, 7 }
  0x1d   : > { %s3620_s1 = scalar_lea.vmem %s3949_s13, %s3011_s17  ;;  %s733_s2 = scalar_lea.vmem %s3950_s14, %s3570_s29 }
  0x1e   : > { %v738_v0 = vld [vmem:[%s3971_s25] sm:$0xff] (!%p2958_p4)  ;;  %v739_v1 = vld [vmem:[%s3971_s25 + $0x8] sm:$0xff] (!%p2958_p4) }
  0x1f   : > { %741 = vst.msk [vmem:[#allocation2] sm:$0xff] %vm740_vm0, %v738_v0  ;;  %742 = vst.msk [vmem:[#allocation2 + $0x8] sm:$0xff] %vm740_vm0, %v739_v1 }
  0x20 PF: > { %vm747_vm1 = vcmask 261120   ;;  %v791_v16 = vld [vmem:[%s3588_s30] sm:$0xff]  ;;  %v792_v17 = vld [vmem:[%s3588_s30 + $0x8] sm:$0xff]  ;;  %v793_v18 = vld [vmem:[%s3588_s30 + $0x10] sm:$0xff]  ;;  %s3972_s16 = scalar_lea.vmem %s3939_s3, %s3570_s29  ;;  %s3973_s21 = scalar_lea.vmem %s3940_s4, %s3570_s29  ;;  %v3443_v38 = vmov 0.0   ;;  %vm3444_vm2 = vmmov 0  }
  0x21   : > { %v3254_v19 = vpack.c.bf16 %v792_v17, %v791_v16  ;;  %v794_v20 = vld [vmem:[%s3588_s30 + $0x18] sm:$0xff]  ;;  %v2959_v29 = vld [vmem:[%s3972_s16] ss:$0 sm:$0xff]  ;;  %3109 = vmatprep.subr.mxu0 %v3443_v38  ;;  %3111 = vmatprep.mubr.msk.f32.mxu0 %vm3444_vm2, %v3443_v38  ;;  %s3974_s22 = scalar_lea.vmem %s3942_s6, %s3570_s29  ;;  %s3445_s26 = smov 96   ;;  %vm887_vm3 = vcmask 64512   ;;  %vm2248_vm4 = vcmask 195584  }
  0x22   : > { %v3258_v21 = vpack.c.bf16 %v794_v20, %v793_v18  ;;  %v2960_v31 = vld [vmem:[%s3973_s21] ss:$0 sm:$0xff]  ;;  %s3975_s0 = sld [smem:[#allocation8_spill]]  ;;  %s3446_s16 = smov 64   ;;  %vm2245_vm5 = vcmask 130048  }
  0x23   : > { %3255 = vmatprep.subr.bf16.mxu1 %v3254_v19  ;;  %v2961_v39 = vld [vmem:[%s3974_s22] ss:$0 sm:$0xff]  ;;  %s3447_s30 = smov 88   ;;  %s3448_s19 = smov 120  }
  0x24   : > { %3257 = vmatpush3.bf16.msra.mxu1 %v3254_v19  ;;  %s3449_s21 = smov 56   ;;  %s3450_s20 = smov 80  }
  0x25   : > { %3259 = vmatprep.subr.bf16.mxu1 %v3258_v21  ;;  %s3451_s23 = smov 112   ;;  %s3452_s22 = smov 48  }
  0x26   : > { %v3633_v2 = vld [vmem:[#allocation2] sm:$0xff]  ;;  %v3635_v3 = vld [vmem:[#allocation2 + $0x8] sm:$0xff]  ;;  %s3454_s27 = smov 104   ;;  %s3455_s17 = smov 40  }
  0x27   : > { %v748_v4 = vsel %vm747_vm1, %v3633_v2, 0.0  ;;  %v751_v5 = vsel %vm747_vm1, %v3635_v3, 0.0  ;;  %p2999_p5 = scmp.ne.s32.totalorder %s3564_s28, 1 }
  0x28   : > { %749 = vadd.xlane.f32.xlu0 %v748_v4  ;;  %3261 = vmatpush3.bf16.msra.mxu1 %v3258_v21  ;;  %v3693_v47 = vld [vmem:[%s3975_s0] sm:$0xff]  ;;  %s3456_s0 = smov 8   ;;  %vm3460_vm6 = vmmov (!%p2999_p5), 0   ;;  %vm2679_vm7 = vcmask (!%p2999_p5), 254976  }
  0x29   : > { %3099 = vmatprep.subr.mxu1 %v3443_v38 }
  0x2c   : > { %752 = vadd.xlane.f32.xlu0 %v751_v5 }
  0xb5   : > { %v750_v6 = vpop.xlane.xlu0 %749 }
  0xb6   : > { %v755_v7 = vmul.f32 0.03125, %v750_v6 }
  0xb8   : > { %v757_v8 = vsub.f32 %v3633_v2, %v755_v7 }
  0xb9   : > { %v753_v9 = vpop.xlane.xlu0 %752 }
  0xba   : > { %v756_v10 = vmul.f32 0.03125, %v753_v9  ;;  %v759_v11 = vmul.f32 %v757_v8, %v757_v8 }
  0xbc   : > { %v758_v12 = vsub.f32 %v3635_v3, %v756_v10  ;;  %v761_v13 = vsel %vm747_vm1, %v759_v11, 0.0 }
  0xbd   : > { %762 = vadd.xlane.f32.xlu1 %v761_v13 }
  0xbe   : > { %v760_v14 = vmul.f32 %v758_v12, %v758_v12 }
  0xc0   : > { %v764_v15 = vsel %vm747_vm1, %v760_v14, 0.0 }
  0xc1   : > { %765 = vadd.xlane.f32.xlu1 %v764_v15 }
 0x14a   : > { %v763_v22 = vpop.xlane.xlu1 %762 }
 0x14b   : > { %v767_v23 = vmul.f32 0.03125, %v763_v22 }
 0x14d   : > { %v769_v24 = vadd.f32 1e-05, %v767_v23 }
 0x14e   : > { %v766_v25 = vpop.xlane.xlu1 %765 }
 0x14f   : > { %3353 = vrsqrt.f32 %v769_v24  ;;  %v768_v26 = vmul.f32 0.03125, %v766_v25 }
 0x151   : > { %v770_v27 = vadd.f32 1e-05, %v768_v26 }
 0x153   : > { %3355 = vrsqrt.f32 %v770_v27 }
 0x159   : > { %v3354_v28 = vpop.eup %3353 }
 0x15a   : > { %v773_v30 = vmul.f32 %v3354_v28, %v757_v8 }
 0x15c   : > { %v781_v32 = vmul.f32 %v2959_v29, %v773_v30 }
 0x15d   : > { %v3356_v33 = vpop.eup %3355 }
 0x15e   : > { %v774_v34 = vmul.f32 %v3356_v33, %v758_v12  ;;  %v789_v35 = vadd.f32 %v2960_v31, %v781_v32 }
 0x160   : > { %v782_v36 = vmul.f32 %v2959_v29, %v774_v34  ;;  %3096 = vmatprep.mubr.msk.f32.mxu1 %vm747_vm1, %v789_v35 }
 0x162   : > { %v790_v37 = vadd.f32 %v2960_v31, %v782_v36 }
 0x164   : > { %3097 = vmatmul.mubr.msk.f32.vlgmr.msra.gmra.mrb[0].mxu1 %vm747_vm1, %v790_v37 }
 0x165   : > { %3101 = vmatprep.mubr.msk.f32.mxu1 %vm3444_vm2, %v3443_v38 }
 0x237   : > { %v3098_v40 = vpop.f32.mrb[0].mxu1 }
 0x238   : > { %v3672_v41 = vadd.f32 %v3098_v40, %v2961_v39  ;;  %v874_v42 = vpop.f32.mrb[1].mxu1 }
 0x239   : > { %v3674_v43 = vadd.f32 %v2961_v39, %v874_v42 }
 0x23a   : > { %963 = vrot.lane.b32.xlu1 %v3672_v41, %s3445_s26 }
 0x23b   : > { %885 = vrot.lane.b32.xlu0 %v3674_v43, %s3445_s26  ;;  %s3453_s26 = smov 72  }
 0x2ac   : > { %v964_v45 = vpop.permute.xlu1 %963 }
 0x2ad   : > { %v886_v44 = vpop.permute.xlu0 %885 }
 0x2ae   : > { %3100 = vmatpush3.xpose.msk.msra.mxu1 %vm887_vm3, %v886_v44 }
 0x2af   : > { %3104 = vmatprep.subr.mxu1 %v3443_v38 }
 0x2b1   : > { %3102 = vmatmul.mubr.msk.f32.vlgmr.msra.gmra.mrb[2].mxu1 %vm887_vm3, %v3674_v43 }
 0x2b2   : > { %3105 = vmatpush3.xpose.msk.msra.mxu1 %vm887_vm3, %v964_v45  ;;  %3106 = vmatprep.mubr.msk.f32.mxu1 %vm3444_vm2, %v3443_v38 }
 0x2b3   : > { %3114 = vmatprep.subr.mxu1 %v3443_v38 }
 0x2b5   : > { %3107 = vmatmul.mubr.msk.f32.vlgmr.msra.gmra.mrb[4].mxu1 %vm887_vm3, %v3672_v41 }
 0x2b6   : > { %3116 = vmatprep.mubr.msk.f32.mxu1 %vm3444_vm2, %v3443_v38 }
 0x384   : > { %v958_v46 = vpop.f32.mrb[2].mxu1 }
 0x385   : > { %v1039_v48 = vmul.f32 0.35355338, %v958_v46  ;;  %v3103_v49 = vpop.f32.mrb[3].mxu1 }
 0x387   : > { %v1041_v50 = vadd.f32 %v1039_v48, %v3693_v47 }
 0x388   : > { %v1035_v51 = vpop.f32.mrb[4].mxu1 }
 0x389   : > { %v1040_v52 = vmul.f32 0.35355338, %v1035_v51  ;;  %v3108_v53 = vpop.f32.mrb[5].mxu1  ;;  %v1043_v54 = vsel %vm887_vm3, %v1041_v50, -inf }
 0x38a   : > { %1044 = vmax.xlane.f32.xlu1 %v1043_v54 }
 0x38b   : > { %v1042_v55 = vadd.f32 %v1040_v52, %v3693_v47 }
 0x38d   : > { %v1046_v56 = vsel %vm887_vm3, %v1042_v55, -inf }
 0x38e   : > { %1047 = vmax.xlane.f32.xlu0 %v1046_v56 }
 0x39b   : > { %1141 = vrot.lane.b32.xlu1 %v3672_v41, %s3446_s16 }
 0x39f   : > { %1219 = vrot.lane.b32.xlu1 %v3674_v43, %s3447_s30 }
 0x3a3   : > { %1297 = vrot.lane.b32.xlu1 %v3672_v41, %s3447_s30  ;;  %s3458_s30 = smov 24  }
 0x3a4   : > { %1065 = vrot.lane.b32.xlu0 %v3674_v43, %s3446_s16  ;;  %s3457_s16 = smov 16  }
 0x417   : > { %v1045_v57 = vpop.xlane.xlu1 %1044 }
 0x418   : > { %v1049_v58 = vsub.f32 %v1041_v50, %v1045_v57 }
 0x41a   : > { %v1051_v59 = vmul.f32 1.442695, %v1049_v58 }
 0x41b   : > { %v1142_v60 = vpop.permute.xlu1 %1141  ;;  %v1048_v61 = vpop.xlane.xlu0 %1047 }
 0x41c   : > { %3357 = vpow2.f32 %v1051_v59  ;;  %v1050_v62 = vsub.f32 %v1042_v55, %v1048_v61  ;;  %3115 = vmatpush3.msra.mxu1 %v1142_v60 }
 0x41d   : > { %3124 = vmatprep.subr.mxu1 %v3443_v38 }
 0x41e   : > { %v1053_v63 = vmul.f32 1.442695, %v1050_v62 }
 0x41f   : > { %v1066_v0 = vpop.permute.xlu0 %1065  ;;  %v1220_v7 = vpop.permute.xlu1 %1219 }
 0x420   : > { %3359 = vpow2.f32 %v1053_v63  ;;  %3110 = vmatpush3.msra.mxu0 %v1066_v0 }
 0x421   : > { %3119 = vmatprep.subr.mxu0 %v3443_v38 }
 0x423   : > { %v1298_v8 = vpop.permute.xlu1 %1297 }
 0x426   : > { %v3358_v1 = vpop.eup %3357 }
 0x427   : > { %v1055_v4 = vsel %vm887_vm3, %v3358_v1, 0.0 }
 0x428   : > { %1056 = vadd.xlane.f32.xlu0 %v1055_v4 }
 0x42a   : > { %v3360_v5 = vpop.eup %3359 }
 0x42b   : > { %v1058_v6 = vsel %vm887_vm3, %v3360_v5, 0.0 }
 0x42c   : > { %1059 = vadd.xlane.f32.xlu1 %v1058_v6 }
 0x43d   : > { %1295 = vrot.lane.b32.xlu1 %v3672_v41, %s3448_s19 }
 0x43e   : > { %1217 = vrot.lane.b32.xlu0 %v3674_v43, %s3448_s19 }
 0x4b5   : > { %v1057_v9 = vpop.xlane.xlu0 %1056 }
 0x4b6   : > { %3361 = vrcp.f32 %v1057_v9 }
 0x4b9   : > { %v1060_v10 = vpop.xlane.xlu1 %1059  ;;  %v1218_v15 = vpop.permute.xlu0 %1217 }
 0x4ba   : > { %3363 = vrcp.f32 %v1060_v10 }
 0x4bd   : > { %v1296_v16 = vpop.permute.xlu1 %1295 }
 0x4c0   : > { %v3362_v11 = vpop.eup %3361 }
 0x4c1   : > { %v1063_v12 = vmul.f32 %v3362_v11, %v3358_v1 }
 0x4c3   : > { %3112 = vmatmul.mubr.msk.f32.vlgmr.msra.gmra.mrb[0].mxu0 %vm887_vm3, %v1063_v12 }
 0x4c4   : > { %v3364_v13 = vpop.eup %3363  ;;  %3120 = vmatpush3.xpose.msk.msra.mxu0 %vm887_vm3, %v1220_v7  ;;  %3121 = vmatprep.mubr.msk.f32.mxu0 %vm3444_vm2, %v3443_v38 }
 0x4c5   : > { %v1064_v14 = vmul.f32 %v3364_v13, %v3360_v5  ;;  %3129 = vmatprep.subr.mxu0 %v3443_v38 }
 0x4c7   : > { %3117 = vmatmul.mubr.msk.f32.vlgmr.msra.gmra.mrb[6].mxu1 %vm887_vm3, %v1064_v14  ;;  %3122 = vmatmul.mubr.msk.f32.vlgmr.msra.gmra.mrb[2].mxu0 %vm887_vm3, %v1218_v15 }
 0x4c8   : > { %3125 = vmatpush3.xpose.msk.msra.mxu1 %vm887_vm3, %v1298_v8  ;;  %3126 = vmatprep.mubr.msk.f32.mxu1 %vm3444_vm2, %v3443_v38 }
 0x4c9   : > { %3134 = vmatprep.subr.mxu1 %v3443_v38  ;;  %3131 = vmatprep.mubr.msk.f32.mxu0 %vm3444_vm2, %v3443_v38 }
 0x4cb   : > { %3127 = vmatmul.mubr.msk.f32.vlgmr.msra.gmra.mrb[8].mxu1 %vm887_vm3, %v1296_v16 }
 0x4cc   : > { %3136 = vmatprep.mubr.msk.f32.mxu1 %vm3444_vm2, %v3443_v38 }
 0x596   : > { %v3725_v17 = vpop.f32.mrb[0].mxu0 }
 0x597   : > { %v3113_v18 = vpop.f32.mrb[1].mxu0 }
 0x59a   : > { %v3727_v19 = vpop.f32.mrb[6].mxu1  ;;  %v1291_v20 = vpop.f32.mrb[2].mxu0 }
 0x59b   : > { %v1373_v21 = vmul.f32 0.35355338, %v1291_v20  ;;  %v3118_v22 = vpop.f32.mrb[7].mxu1  ;;  %v3123_v23 = vpop.f32.mrb[3].mxu0 }
 0x59d   : > { %v1375_v24 = vadd.f32 %v1373_v21, %v3693_v47 }
 0x59e   : > { %v1369_v25 = vpop.f32.mrb[8].mxu1 }
 0x59f   : > { %v1374_v26 = vmul.f32 0.35355338, %v1369_v25  ;;  %v3128_v27 = vpop.f32.mrb[9].mxu1  ;;  %v1377_v28 = vsel %vm887_vm3, %v1375_v24, -inf }
 0x5a0   : > { %1378 = vmax.xlane.f32.xlu0 %v1377_v28 }
 0x5a1   : > { %v1376_v29 = vadd.f32 %v1374_v26, %v3693_v47 }
 0x5a3   : > { %v1380_v30 = vsel %vm887_vm3, %v1376_v29, -inf }
 0x5a4   : > { %1381 = vmax.xlane.f32.xlu1 %v1380_v30 }
 0x5b5   : > { %1475 = vrot.lane.b32.xlu1 %v3672_v41, %s3449_s21 }
 0x5b6   : > { %1399 = vrot.lane.b32.xlu0 %v3674_v43, %s3449_s21  ;;  %s3976_s21 = scalar_lea.vmem %s3944_s8, %s3570_s29 }
 0x5b9   : > { %1553 = vrot.lane.b32.xlu1 %v3674_v43, %s3450_s20 }
 0x5bd   : > { %1631 = vrot.lane.b32.xlu1 %v3672_v41, %s3450_s20 }
 0x5c1   : > { %1629 = vrot.lane.b32.xlu1 %v3672_v41, %s3451_s23 }
 0x62d   : > { %v1379_v31 = vpop.xlane.xlu0 %1378 }
 0x62e   : > { %v1383_v32 = vsub.f32 %v1375_v24, %v1379_v31 }
 0x630   : > { %v1385_v33 = vmul.f32 1.442695, %v1383_v32 }
 0x631   : > { %v1400_v34 = vpop.permute.xlu0 %1399  ;;  %v1382_v35 = vpop.xlane.xlu1 %1381 }
 0x632   : > { %3365 = vpow2.f32 %v1385_v33  ;;  %v1384_v36 = vsub.f32 %v1376_v29, %v1382_v35  ;;  %3130 = vmatpush3.msra.mxu0 %v1400_v34 }
 0x633   : > { %3139 = vmatprep.subr.mxu0 %v3443_v38 }
 0x634   : > { %v1387_v37 = vmul.f32 1.442695, %v1384_v36 }
 0x635   : > { %v1476_v39 = vpop.permute.xlu1 %1475 }
 0x636   : > { %3367 = vpow2.f32 %v1387_v37  ;;  %3135 = vmatpush3.msra.mxu1 %v1476_v39 }
 0x637   : > { %3144 = vmatprep.subr.mxu1 %v3443_v38 }
 0x639   : > { %v1554_v49 = vpop.permute.xlu1 %1553 }
 0x63c   : > { %v3366_v40 = vpop.eup %3365 }
 0x63d   : > { %v1389_v42 = vsel %vm887_vm3, %v3366_v40, 0.0  ;;  %v1632_v53 = vpop.permute.xlu1 %1631 }
 0x63e   : > { %1390 = vadd.xlane.f32.xlu0 %v1389_v42 }
 0x640   : > { %v3368_v44 = vpop.eup %3367 }
 0x641   : > { %v1392_v45 = vsel %vm887_vm3, %v3368_v44, 0.0  ;;  %v1630_v56 = vpop.permute.xlu1 %1629 }
 0x642   : > { %1393 = vadd.xlane.f32.xlu0 %v1392_v45 }
 0x658   : > { %1551 = vrot.lane.b32.xlu0 %v3674_v43, %s3451_s23 }
 0x6cb   : > { %v1391_v46 = vpop.xlane.xlu0 %1390 }
 0x6cc   : > { %3369 = vrcp.f32 %v1391_v46 }
 0x6cf   : > { %v1394_v48 = vpop.xlane.xlu0 %1393 }
 0x6d0   : > { %3371 = vrcp.f32 %v1394_v48 }
 0x6d3   : > { %v1552_v55 = vpop.permute.xlu0 %1551 }
 0x6d6   : > { %v3370_v50 = vpop.eup %3369 }
 0x6d7   : > { %v1397_v51 = vmul.f32 %v3370_v50, %v3366_v40 }
 0x6d9   : > { %3132 = vmatmul.mubr.msk.f32.vlgmr.msra.gmra.mrb[4].mxu0 %vm887_vm3, %v1397_v51 }
 0x6da   : > { %v3372_v52 = vpop.eup %3371  ;;  %3140 = vmatpush3.xpose.msk.msra.mxu0 %vm887_vm3, %v1554_v49  ;;  %3141 = vmatprep.mubr.msk.f32.mxu0 %vm3444_vm2, %v3443_v38 }
 0x6db   : > { %v1398_v54 = vmul.f32 %v3372_v52, %v3368_v44  ;;  %3149 = vmatprep.subr.mxu0 %v3443_v38 }
 0x6dd   : > { %3137 = vmatmul.mubr.msk.f32.vlgmr.msra.gmra.mrb[10].mxu1 %vm887_vm3, %v1398_v54  ;;  %3142 = vmatmul.mubr.msk.f32.vlgmr.msra.gmra.mrb[6].mxu0 %vm887_vm3, %v1552_v55 }
 0x6de   : > { %3145 = vmatpush3.xpose.msk.msra.mxu1 %vm887_vm3, %v1632_v53  ;;  %3146 = vmatprep.mubr.msk.f32.mxu1 %vm3444_vm2, %v3443_v38 }
 0x6df   : > { %3154 = vmatprep.subr.mxu1 %v3443_v38  ;;  %3151 = vmatprep.mubr.msk.f32.mxu0 %vm3444_vm2, %v3443_v38 }
 0x6e1   : > { %3147 = vmatmul.mubr.msk.f32.vlgmr.msra.gmra.mrb[12].mxu1 %vm887_vm3, %v1630_v56 }
 0x6e2   : > { %3156 = vmatprep.mubr.msk.f32.mxu1 %vm3444_vm2, %v3443_v38 }
 0x7ac   : > { %v3759_v57 = vpop.f32.mrb[4].mxu0 }
 0x7ad   : > { %v3133_v58 = vpop.f32.mrb[5].mxu0 }
 0x7b0   : > { %v3761_v59 = vpop.f32.mrb[10].mxu1  ;;  %v1625_v60 = vpop.f32.mrb[6].mxu0 }
 0x7b1   : > { %v1707_v61 = vmul.f32 0.35355338, %v1625_v60  ;;  %v3138_v62 = vpop.f32.mrb[11].mxu1  ;;  %v3143_v63 = vpop.f32.mrb[7].mxu0 }
 0x7b3   : > { %v1709_v0 = vadd.f32 %v1707_v61, %v3693_v47 }
 0x7b4   : > { %v1703_v1 = vpop.f32.mrb[12].mxu1 }
 0x7b5   : > { %v1708_v4 = vmul.f32 0.35355338, %v1703_v1  ;;  %v3148_v5 = vpop.f32.mrb[13].mxu1  ;;  %v1711_v6 = vsel %vm887_vm3, %v1709_v0, -inf }
 0x7b6   : > { %1712 = vmax.xlane.f32.xlu0 %v1711_v6  ;;  %v2252_v5 = vld [vmem:[%s3593_s18 + $0x8] sm:$0xff]  ;;  %v2253_v6 = vld [vmem:[%s3593_s18 + $0x10] sm:$0xff] }
 0x7b7   : > { %v1710_v7 = vadd.f32 %v1708_v4, %v3693_v47  ;;  %v2251_v4 = vld [vmem:[%s3593_s18] sm:$0xff] }
 0x7b9   : > { %v1714_v8 = vsel %vm887_vm3, %v1710_v7, -inf }
 0x7ba   : > { %1715 = vmax.xlane.f32.xlu1 %v1714_v8 }
 0x7cb   : > { %1809 = vrot.lane.b32.xlu1 %v3672_v41, %s3452_s22 }
 0x7cc   : > { %1733 = vrot.lane.b32.xlu0 %v3674_v43, %s3452_s22  ;;  %s3979_s22 = sld [smem:[#allocation12_spill]] (!%p2999_p5) }
 0x7cf   : > { %1887 = vrot.lane.b32.xlu1 %v3674_v43, %s3453_s26 }
 0x7d3   : > { %1965 = vrot.lane.b32.xlu1 %v3672_v41, %s3453_s26  ;;  %s3977_s26 = sld [smem:[#allocation9_spill]] (!%p2999_p5) }
 0x7d7   : > { %1963 = vrot.lane.b32.xlu1 %v3672_v41, %s3454_s27 }
 0x843   : > { %v1713_v9 = vpop.xlane.xlu0 %1712 }
 0x844   : > { %v1717_v10 = vsub.f32 %v1709_v0, %v1713_v9 }
 0x846   : > { %v1719_v11 = vmul.f32 1.442695, %v1717_v10 }
 0x847   : > { %v1734_v12 = vpop.permute.xlu0 %1733  ;;  %v1716_v13 = vpop.xlane.xlu1 %1715 }
 0x848   : > { %3373 = vpow2.f32 %v1719_v11  ;;  %v1718_v14 = vsub.f32 %v1710_v7, %v1716_v13  ;;  %3150 = vmatpush3.msra.mxu0 %v1734_v12  ;;  %v2254_v7 = vld [vmem:[%s3593_s18 + $0x18] sm:$0xff] }
 0x849   : > { %3159 = vmatprep.subr.mxu0 %v3443_v38  ;;  %v3266_v8 = vpack.c.bf16 %v2254_v7, %v2253_v6  ;;  %v2500_v6 = vld [vmem:[%s3620_s1 + $0x18] sm:$0xff] }
 0x84a   : > { %v1721_v15 = vmul.f32 1.442695, %v1718_v14 }
 0x84b   : > { %v1810_v16 = vpop.permute.xlu1 %1809 }
 0x84c   : > { %3375 = vpow2.f32 %v1721_v15  ;;  %3155 = vmatpush3.msra.mxu1 %v1810_v16 }
 0x84d   : > { %3164 = vmatprep.subr.mxu1 %v3443_v38 }
 0x84f   : > { %v1888_v25 = vpop.permute.xlu1 %1887 }
 0x852   : > { %v3374_v18 = vpop.eup %3373 }
 0x853   : > { %v1723_v20 = vsel %vm887_vm3, %v3374_v18, 0.0  ;;  %v1966_v29 = vpop.permute.xlu1 %1965 }
 0x854   : > { %1724 = vadd.xlane.f32.xlu0 %v1723_v20 }
 0x856   : > { %v3376_v21 = vpop.eup %3375 }
 0x857   : > { %v1726_v22 = vsel %vm887_vm3, %v3376_v21, 0.0  ;;  %v1964_v32 = vpop.permute.xlu1 %1963 }
 0x858   : > { %1727 = vadd.xlane.f32.xlu0 %v1726_v22 }
 0x86e   : > { %1885 = vrot.lane.b32.xlu0 %v3674_v43, %s3454_s27 }
 0x8e1   : > { %v1725_v23 = vpop.xlane.xlu0 %1724 }
 0x8e2   : > { %3377 = vrcp.f32 %v1725_v23 }
 0x8e5   : > { %v1728_v24 = vpop.xlane.xlu0 %1727 }
 0x8e6   : > { %3379 = vrcp.f32 %v1728_v24 }
 0x8e9   : > { %v1886_v31 = vpop.permute.xlu0 %1885 }
 0x8ec   : > { %v3378_v26 = vpop.eup %3377 }
 0x8ed   : > { %v1731_v27 = vmul.f32 %v3378_v26, %v3374_v18 }
 0x8ef   : > { %3152 = vmatmul.mubr.msk.f32.vlgmr.msra.gmra.mrb[8].mxu0 %vm887_vm3, %v1731_v27 }
 0x8f0   : > { %v3380_v28 = vpop.eup %3379  ;;  %3160 = vmatpush3.xpose.msk.msra.mxu0 %vm887_vm3, %v1888_v25  ;;  %3161 = vmatprep.mubr.msk.f32.mxu0 %vm3444_vm2, %v3443_v38 }
 0x8f1   : > { %v1732_v30 = vmul.f32 %v3380_v28, %v3376_v21  ;;  %3169 = vmatprep.subr.mxu0 %v3443_v38 }
 0x8f3   : > { %3157 = vmatmul.mubr.msk.f32.vlgmr.msra.gmra.mrb[14].mxu1 %vm887_vm3, %v1732_v30  ;;  %3162 = vmatmul.mubr.msk.f32.vlgmr.msra.gmra.mrb[10].mxu0 %vm887_vm3, %v1886_v31 }
 0x8f4   : > { %3165 = vmatpush3.xpose.msk.msra.mxu1 %vm887_vm3, %v1966_v29  ;;  %3166 = vmatprep.mubr.msk.f32.mxu1 %vm3444_vm2, %v3443_v38 }
 0x8f5   : > { %3174 = vmatprep.subr.mxu1 %v3443_v38  ;;  %3171 = vmatprep.mubr.msk.f32.mxu0 %vm3444_vm2, %v3443_v38 }
 0x8f7   : > { %3167 = vmatmul.mubr.msk.f32.vlgmr.msra.gmra.mrb[16].mxu1 %vm887_vm3, %v1964_v32 }
 0x8f8   : > { %3176 = vmatprep.mubr.msk.f32.mxu1 %vm3444_vm2, %v3443_v38 }
 0x9c2   : > { %v1805_v33 = vpop.f32.mrb[8].mxu0 }
 0x9c3   : > { %v3153_v34 = vpop.f32.mrb[9].mxu0 }
 0x9c6   : > { %v1881_v35 = vpop.f32.mrb[14].mxu1  ;;  %v1959_v36 = vpop.f32.mrb[10].mxu0 }
 0x9c7   : > { %v2041_v37 = vmul.f32 0.35355338, %v1959_v36  ;;  %v3158_v39 = vpop.f32.mrb[15].mxu1  ;;  %v3163_v40 = vpop.f32.mrb[11].mxu0 }
 0x9c9   : > { %v2043_v42 = vadd.f32 %v2041_v37, %v3693_v47 }
 0x9ca   : > { %v2037_v44 = vpop.f32.mrb[16].mxu1 }
 0x9cb   : > { %v2042_v45 = vmul.f32 0.35355338, %v2037_v44  ;;  %v3168_v46 = vpop.f32.mrb[17].mxu1  ;;  %v2045_v48 = vsel %vm887_vm3, %v2043_v42, -inf }
 0x9cc   : > { %2046 = vmax.xlane.f32.xlu0 %v2045_v48  ;;  %v2390_v46 = vld [vmem:[%s3610_s5 + $0x8] sm:$0xff] }
 0x9cd   : > { %v2044_v49 = vadd.f32 %v2042_v45, %v3693_v47  ;;  %v2389_v45 = vld [vmem:[%s3610_s5] sm:$0xff] }
 0x9ce   : > { %v3270_v48 = vpack.c.bf16 %v2390_v46, %v2389_v45  ;;  %v2998_v46 = vld [vmem:[%s733_s2] ss:$0 sm:$0xff] }
 0x9cf   : > { %v2048_v50 = vsel %vm887_vm3, %v2044_v49, -inf }
 0x9d0   : > { %2049 = vmax.xlane.f32.xlu1 %v2048_v50  ;;  %v2392_v50 = vld [vmem:[%s3610_s5 + $0x18] sm:$0xff] }
 0x9e1   : > { %2143 = vrot.lane.b32.xlu1 %v3672_v41, %s3455_s17 }
 0x9e5   : > { %2221 = vrot.lane.b32.xlu1 %v3759_v57, %s3456_s0 }
 0x9e9   : > { %2223 = vrot.lane.b32.xlu1 %v3761_v59, %s3456_s0  ;;  %s3978_s0 = sld [smem:[#allocation14_spill]] (!%p2999_p5) }
 0x9ed   : > { %2231 = vrot.lane.b32.xlu1 %v1881_v35, %s3457_s16 }
 0xa59   : > { %v2047_v38 = vpop.xlane.xlu0 %2046 }
 0xa5a   : > { %v2051_v51 = vsub.f32 %v2043_v42, %v2047_v38 }
 0xa5c   : > { %v2053_v52 = vmul.f32 1.442695, %v2051_v51 }
 0xa5d   : > { %v2050_v53 = vpop.xlane.xlu1 %2049 }
 0xa5e   : > { %3381 = vpow2.f32 %v2053_v52  ;;  %v2052_v54 = vsub.f32 %v2044_v49, %v2050_v53  ;;  %v2391_v49 = vld [vmem:[%s3610_s5 + $0x10] sm:$0xff] }
 0xa5f   : > { %v3274_v38 = vpack.c.bf16 %v2392_v50, %v2391_v49 }
 0xa60   : > { %v2055_v47 = vmul.f32 1.442695, %v2052_v54 }
 0xa61   : > { %v2144_v55 = vpop.permute.xlu1 %2143 }
 0xa62   : > { %3383 = vpow2.f32 %v2055_v47  ;;  %3175 = vmatpush3.msra.mxu1 %v2144_v55 }
 0xa65   : > { %v2222_v13 = vpop.permute.xlu1 %2221 }
 0xa66   : > { %v2243_v16 = vsel %vm887_vm3, %v3725_v17, %v2222_v13  ;;  %v2988_v17 = vld [vmem:[%s3976_s21] ss:$0 sm:$0xff] }
 0xa68   : > { %v3382_v56 = vpop.eup %3381 }
 0xa69   : > { %v2057_v41 = vsel %vm887_vm3, %v3382_v56, 0.0  ;;  %v2224_v14 = vpop.permute.xlu1 %2223 }
 0xa6a   : > { %2058 = vadd.xlane.f32.xlu0 %v2057_v41  ;;  %v2244_v23 = vsel %vm887_vm3, %v3727_v19, %v2224_v14  ;;  %v2991_v41 = vld [vmem:[%s714_s15] ss:$0 sm:$0xff] }
 0xa6b   : > { %v2505_v14 = vld [vmem:[%s3620_s1 + $0x40] sm:$0xff] }
 0xa6c   : > { %v3384_v58 = vpop.eup %3383 }
 0xa6d   : > { %v2060_v57 = vsel %vm887_vm3, %v3384_v58, 0.0  ;;  %v2232_v18 = vpop.permute.xlu1 %2231 }
 0xa6e   : > { %2061 = vadd.xlane.f32.xlu0 %v2060_v57  ;;  %v2247_v24 = vsel %vm2245_vm5, %v2244_v23, %v2232_v18  ;;  %v2992_v57 = vld [vmem:[%s717_s24] ss:$0 sm:$0xff]  ;;  %v2507_v18 = vld [vmem:[%s3620_s1 + $0x50] sm:$0xff]  ;;  %v2510_v23 = vld [vmem:[%s3620_s1 + $0x68] sm:$0xff] }
 0xa84   : > { %2067 = vrot.lane.b32.xlu0 %v3674_v43, %s3455_s17  ;;  %v3262_v43 = vpack.c.bf16 %v2252_v5, %v2251_v4  ;;  %v2498_v4 = vld [vmem:[%s3620_s1 + $0x8] sm:$0xff] }
 0xa86   : > { %3263 = vmatprep.subr.bf16.mxu1 %v3262_v43 }
 0xa88   : > { %2229 = vrot.lane.b32.xlu0 %v1805_v33, %s3457_s16 }
 0xaf7   : > { %v2059_v59 = vpop.xlane.xlu0 %2058 }
 0xaf8   : > { %3385 = vrcp.f32 %v2059_v59 }
 0xafb   : > { %v2062_v60 = vpop.xlane.xlu0 %2061 }
 0xafc   : > { %3387 = vrcp.f32 %v2062_v60 }
 0xaff   : > { %v2068_v61 = vpop.permute.xlu0 %2067 }
 0xb00   : > { %3170 = vmatpush3.msra.mxu0 %v2068_v61 }
 0xb02   : > { %v3386_v62 = vpop.eup %3385 }
 0xb03   : > { %v2065_v63 = vmul.f32 %v3386_v62, %v3382_v56  ;;  %v2230_v15 = vpop.permute.xlu0 %2229 }
 0xb04   : > { %v2246_v20 = vsel %vm2245_vm5, %v2243_v16, %v2230_v15  ;;  %v2506_v15 = vld [vmem:[%s3620_s1 + $0x48] sm:$0xff] }
 0xb05   : > { %3172 = vmatmul.mubr.msk.f32.vlgmr.msra.gmra.mrb[12].mxu0 %vm887_vm3, %v2065_v63  ;;  %v3294_v16 = vpack.c.bf16 %v2506_v15, %v2505_v14 }
 0xb06   : > { %v3388_v0 = vpop.eup %3387 }
 0xb07   : > { %v2066_v1 = vmul.f32 %v3388_v0, %v3384_v58 }
 0xb09   : > { %3177 = vmatmul.mubr.msk.f32.vlgmr.msra.gmra.mrb[18].mxu1 %vm887_vm3, %v2066_v1  ;;  %v2497_v1 = vld [vmem:[%s3620_s1] sm:$0xff] }
 0xb0a   : > { %3265 = vmatpush3.bf16.msra.mxu1 %v3262_v43  ;;  %v3278_v5 = vpack.c.bf16 %v2498_v4, %v2497_v1  ;;  %v2499_v43 = vld [vmem:[%s3620_s1 + $0x10] sm:$0xff]  ;;  %v2710_v1 = vld [vmem:[%s3978_s0 + $0x18] sm:$0xff] (!%p2999_p5) }
 0xb0b   : > { %3267 = vmatprep.subr.bf16.mxu1 %v3266_v8  ;;  %v3282_v7 = vpack.c.bf16 %v2500_v6, %v2499_v43 }
 0xb0c   : > { %3279 = vmatprep.subr.bf16.mxu0 %v3278_v5 }
 0xb0d   : > { %3281 = vmatpush3.bf16.msra.mxu0 %v3278_v5 }
 0xb0e   : > { %3269 = vmatpush3.bf16.msra.mxu1 %v3266_v8  ;;  %3283 = vmatprep.subr.bf16.mxu0 %v3282_v7  ;;  %v2501_v8 = vld [vmem:[%s3620_s1 + $0x20] sm:$0xff] }
 0xb0f   : > { %3271 = vmatprep.subr.bf16.mxu1 %v3270_v48 }
 0xb11   : > { %3285 = vmatpush3.bf16.msra.mxu0 %v3282_v7 }
 0xbd8   : > { %v2139_v9 = vpop.f32.mrb[12].mxu0 }
 0xbd9   : > { %2237 = vrot.lane.b32.xlu0 %v2139_v9, %s3458_s30  ;;  %v3173_v10 = vpop.f32.mrb[13].mxu0  ;;  %v2502_v9 = vld [vmem:[%s3620_s1 + $0x28] sm:$0xff] }
 0xbda   : > { %v3286_v10 = vpack.c.bf16 %v2502_v9, %v2501_v8  ;;  %v3001_v8 = vld [vmem:[%s3979_s22] ss:$0 sm:$0xff] (!%p2999_p5) }
 0xbdc   : > { %v2215_v11 = vpop.f32.mrb[18].mxu1  ;;  %3287 = vmatprep.subr.bf16.mxu0 %v3286_v10 }
 0xbdd   : > { %2239 = vrot.lane.b32.xlu1 %v2215_v11, %s3458_s30  ;;  %v3178_v12 = vpop.f32.mrb[19].mxu1  ;;  %3289 = vmatpush3.bf16.msra.mxu0 %v3286_v10  ;;  %v2503_v11 = vld [vmem:[%s3620_s1 + $0x30] sm:$0xff] }
 0xbde   : > { %v2504_v12 = vld [vmem:[%s3620_s1 + $0x38] sm:$0xff] }
 0xbdf   : > { %v3290_v13 = vpack.c.bf16 %v2504_v12, %v2503_v11 }
 0xbe1   : > { %3291 = vmatprep.subr.bf16.mxu0 %v3290_v13 }
 0xbe2   : > { %3293 = vmatpush3.bf16.msra.mxu0 %v3290_v13 }
 0xbe3   : > { %3295 = vmatprep.subr.bf16.mxu0 %v3294_v16 }
 0xbe6   : > { %3297 = vmatpush3.bf16.msra.mxu0 %v3294_v16 }
 0xc4b   : > { %v2238_v21 = vpop.permute.xlu0 %2237 }
 0xc4c   : > { %v2249_v22 = vsel %vm2248_vm4, %v2246_v20, %v2238_v21  ;;  %v2508_v20 = vld [vmem:[%s3620_s1 + $0x58] sm:$0xff] }
 0xc4d   : > { %3187 = vmatprep.mubr.msk.f32.mxu1 %vm747_vm1, %v2249_v22  ;;  %v3298_v21 = vpack.c.bf16 %v2508_v20, %v2507_v18  ;;  %v2509_v22 = vld [vmem:[%s3620_s1 + $0x60] sm:$0xff] }
 0xc4f   : > { %v2240_v25 = vpop.permute.xlu1 %2239  ;;  %3299 = vmatprep.subr.bf16.mxu0 %v3298_v21 }
 0xc50   : > { %v2250_v26 = vsel %vm2248_vm4, %v2247_v24, %v2240_v25  ;;  %3301 = vmatpush3.bf16.msra.mxu0 %v3298_v21  ;;  %v3302_v24 = vpack.c.bf16 %v2510_v23, %v2509_v22  ;;  %v2511_v25 = vld [vmem:[%s3620_s1 + $0x70] sm:$0xff] }
 0xc51   : > { %3188 = vmatmul.mubr.msk.f32.vlgmr.msra.gmra.mrb[20].mxu1 %vm747_vm1, %v2250_v26  ;;  %v2512_v26 = vld [vmem:[%s3620_s1 + $0x78] sm:$0xff] }
 0xc52   : > { %3273 = vmatpush3.bf16.msra.mxu1 %v3270_v48  ;;  %3303 = vmatprep.subr.bf16.mxu0 %v3302_v24 }
 0xc53   : > { %3275 = vmatprep.subr.bf16.mxu1 %v3274_v38 }
 0xc54   : > { %3305 = vmatpush3.bf16.msra.mxu0 %v3302_v24 }
 0xc56   : > { %3277 = vmatpush3.bf16.msra.mxu1 %v3274_v38 }
 0xd24   : > { %v3189_v27 = vpop.f32.mrb[20].mxu1 }
 0xd25   : > { %v2340_v28 = vadd.f32 %v3189_v27, %v2988_v17  ;;  %v2334_v29 = vpop.f32.mrb[21].mxu1  ;;  %v2993_v27 = vld [vmem:[%s725_s7] ss:$0 sm:$0xff]  ;;  %s3980_s7 = sld [smem:[#allocation13_spill]] (!%p2999_p5) }
 0xd26   : > { %v2335_v30 = vadd.f32 %v2988_v17, %v2334_v29  ;;  %v3306_v17 = vpack.c.bf16 %v2512_v26, %v2511_v25 }
 0xd27   : > { %v3823_v31 = vadd.f32 %v2340_v28, %v3635_v3 }
 0xd28   : > { %v3826_v19 = vadd.f32 %v2335_v30, %v3633_v2  ;;  %3307 = vmatprep.subr.bf16.mxu0 %v3306_v17 }
 0xd29   : > { %v2350_v32 = vsel %vm747_vm1, %v3823_v31, 0.0  ;;  %3309 = vmatpush3.bf16.msra.mxu0 %v3306_v17 }
 0xd2a   : > { %2351 = vadd.xlane.f32.xlu1 %v2350_v32  ;;  %v2347_v33 = vsel %vm747_vm1, %v3826_v19, 0.0 }
 0xd2b   : > { %2348 = vadd.xlane.f32.xlu0 %v2347_v33  ;;  %v3002_v10 = vld [vmem:[%s3980_s7] ss:$0 sm:$0xff] (!%p2999_p5) }
 0xdb7   : > { %v2352_v34 = vpop.xlane.xlu1 %2351 }
 0xdb8   : > { %v2354_v35 = vmul.f32 0.03125, %v2352_v34  ;;  %v2349_v36 = vpop.xlane.xlu0 %2348 }
 0xdb9   : > { %v2353_v3 = vmul.f32 0.03125, %v2349_v36 }
 0xdba   : > { %v2356_v37 = vsub.f32 %v3823_v31, %v2354_v35 }
 0xdbb   : > { %v2355_v2 = vsub.f32 %v3826_v19, %v2353_v3 }
 0xdbc   : > { %v2358_v42 = vmul.f32 %v2356_v37, %v2356_v37 }
 0xdbd   : > { %v2357_v39 = vmul.f32 %v2355_v2, %v2355_v2 }
 0xdbe   : > { %v2362_v44 = vsel %vm747_vm1, %v2358_v42, 0.0 }
 0xdbf   : > { %v2359_v40 = vsel %vm747_vm1, %v2357_v39, 0.0 }
 0xdc0   : > { %2360 = vadd.xlane.f32.xlu0 %v2359_v40 }
 0xdc4   : > { %2363 = vadd.xlane.f32.xlu0 %v2362_v44 }
 0xe4d   : > { %v2361_v51 = vpop.xlane.xlu0 %2360 }
 0xe4e   : > { %v2365_v52 = vmul.f32 0.03125, %v2361_v51 }
 0xe50   : > { %v2367_v53 = vadd.f32 1e-05, %v2365_v52 }
 0xe51   : > { %v2364_v54 = vpop.xlane.xlu0 %2363 }
 0xe52   : > { %3389 = vrsqrt.f32 %v2367_v53  ;;  %v2366_v47 = vmul.f32 0.03125, %v2364_v54  ;;  %v3459_v54 = vmov (!%p2999_p5), 0.0|0.0  }
 0xe53   : > { %3310 = vmatprep.subr.bf16.mxu0 (!%p2999_p5), %v3459_v54  ;;  %3313 = vmatprep.subr.bf16.mxu1 (!%p2999_p5), %v3459_v54 }
 0xe54   : > { %v2368_v55 = vadd.f32 1e-05, %v2366_v47  ;;  %v3461_v47 = vmov (!%p2999_p5), 0.0  }
 0xe56   : > { %3391 = vrsqrt.f32 %v2368_v55 }
 0xe5c   : > { %v3390_v56 = vpop.eup %3389 }
 0xe5d   : > { %v2371_v58 = vmul.f32 %v3390_v56, %v2355_v2 }
 0xe5f   : > { %v2379_v59 = vmul.f32 %v2991_v41, %v2371_v58 }
 0xe60   : > { %v3392_v60 = vpop.eup %3391 }
 0xe61   : > { %v2372_v61 = vmul.f32 %v3392_v60, %v2356_v37  ;;  %v2387_v62 = vadd.f32 %v2992_v57, %v2379_v59 }
 0xe63   : > { %v2380_v63 = vmul.f32 %v2991_v41, %v2372_v61  ;;  %3198 = vmatprep.mubr.msk.f32.mxu1 %vm747_vm1, %v2387_v62  ;;  %v2707_v61 = vld [vmem:[%s3978_s0] sm:$0xff] (!%p2999_p5)  ;;  %v2708_v62 = vld [vmem:[%s3978_s0 + $0x8] sm:$0xff] (!%p2999_p5) }
 0xe65   : > { %v2388_v0 = vadd.f32 %v2992_v57, %v2380_v63  ;;  %v2709_v63 = vld [vmem:[%s3978_s0 + $0x10] sm:$0xff] (!%p2999_p5) }
 0xe66   : > { %v3317_v4 = vpack.c.bf16 (!%p2999_p5), %v2710_v1, %v2709_v63 }
 0xe67   : > { %3199 = vmatmul.mubr.msk.f32.vlgmr.msra.gmra.mrb[22].mxu1 %vm747_vm1, %v2388_v0  ;;  %v3314_v0 = vpack.c.bf16 (!%p2999_p5), %v2708_v62, %v2707_v61 }
 0xe68   : > { %3251 = vmatprep.mubr.msk.f32.mxu1 (!%p2999_p5), %vm3460_vm6, %v3461_v47 }
 0xe69   : > { %3315 = vmatpush3.bf16.msra.mxu1 (!%p2999_p5), %v3314_v0 }
 0xe6a   : > { %3316 = vmatprep.subr.bf16.mxu1 (!%p2999_p5), %v3459_v54 }
 0xe6d   : > { %3318 = vmatpush3.bf16.msra.mxu1 (!%p2999_p5), %v3317_v4 }
 0xf3a   : > { %v3200_v28 = vpop.f32.mrb[22].mxu1 }
 0xf3b   : > { %v2478_v29 = vadd.f32 %v3200_v28, %v2993_v27  ;;  %v2472_v30 = vpop.f32.mrb[23].mxu1 }
 0xf3c   : > { %v2473_v32 = vadd.f32 %v2993_v27, %v2472_v30 }
 0xf3d   : > { %v2997_v33 = vmul.f32 -1.702, %v2478_v29 }
 0xf3e   : > { %v2996_v34 = vmul.f32 -1.702, %v2473_v32 }
 0xf3f   : > { %v2487_v35 = vmul.f32 1.442695, %v2997_v33 }
 0xf40   : > { %v2485_v36 = vmul.f32 1.442695, %v2996_v34 }
 0xf41   : > { %3393 = vpow2.f32 %v2487_v35 }
 0xf42   : > { %3395 = vpow2.f32 %v2485_v36 }
 0xf4b   : > { %v3394_v3 = vpop.eup %3393 }
 0xf4c   : > { %v3396_v37 = vpop.eup %3395  ;;  %v2490_v2 = vadd.f32 1.0, %v3394_v3 }
 0xf4d   : > { %v2489_v39 = vadd.f32 1.0, %v3396_v37 }
 0xf4e   : > { %3397 = vrcp.f32 %v2490_v2 }
 0xf4f   : > { %3399 = vrcp.f32 %v2489_v39 }
 0xf58   : > { %v3398_v40 = vpop.eup %3397 }
 0xf59   : > { %v3400_v42 = vpop.eup %3399  ;;  %v2496_v45 = vmul.f32 %v3398_v40, %v2478_v29 }
 0xf5a   : > { %v2495_v44 = vmul.f32 %v3400_v42, %v2473_v32 }
 0xf5c   : > { %3233 = vmatprep.mubr.f32.mxu0 %v2495_v44 }
 0xf5d   : > { %3234 = vmatmul.mubr.f32.vlgmr.msra.gmra.mrb[14].mxu0 %v2496_v45 }
 0xf5e   : > { %3240 = vmatprep.mubr.msk.f32.mxu0 (!%p2999_p5), %vm3460_vm6, %v3461_v47 }
0x1030   : > { %v3235_v48 = vpop.f32.mrb[14].mxu0  ;;  %2602 = sbr.rel (%p2999_p5) target bundleno = 5053 (0x13bd), region = 100 }
0x1031   : > { %v2592_v49 = vadd.f32 %v3235_v48, %v2998_v46  ;;  %v2586_v50 = vpop.f32.mrb[15].mxu0 }
0x1032   : > { %v2587_v38 = vadd.f32 %v2998_v46, %v2586_v50 }
0x1033   : > { %v2596_v51 = vadd.f32 %v2592_v49, %v3823_v31  ;;  %v2603_v31 = vld [vmem:[%s3977_s26] sm:$0x3] (!%p2999_p5) }
0x1034   : > { %v2595_v52 = vadd.f32 %v2587_v38, %v3826_v19 }
0x1035   : > { %2598 = vst.msk [vmem:[#allocation2 + $0x8] sm:$0xff] %vm747_vm1, %v2596_v51 }
0x1036   : > { %2597 = vst.msk [vmem:[#allocation2] sm:$0xff] %vm747_vm1, %v2595_v52  ;;  %v3311_v53 = vpack.c.bf16 (!%p2999_p5), %v2596_v51, %v2595_v52 }
0x1038   : > { %3312 = vmatpush3.bf16.msra.mxu0 %v3311_v53 }
0x103b   : > { %3241 = vmatmul.mubr.msk.f32.vlgmr.msra.gmra.mrb[0].mxu0 %vm2245_vm5, %v2603_v31 }
0x110e   : > { %v2673_v19 = vpop.f32.mrb[0].mxu0 }
0x110f   : > { %v3242_v55 = vpop.f32.mrb[1].mxu0  ;;  %v2680_v56 = vsel %vm2679_vm7, %v2673_v19, 0.0 }
0x1110   : > { %2681 = vadd.xlane.f32.xlu0 %v2680_v56 }
0x119d   : > { %v2682_v41 = vpop.xlane.xlu0 %2681 }
0x119e   : > { %v2683_v58 = vmul.f32 0.03125, %v2682_v41 }
0x11a0   : > { %v2684_v57 = vsub.f32 %v2673_v19, %v2683_v58 }
0x11a2   : > { %v2685_v59 = vmul.f32 %v2684_v57, %v2684_v57 }
0x11a4   : > { %v2686_v60 = vsel %vm2679_vm7, %v2685_v59, 0.0 }
0x11a5   : > { %2687 = vadd.xlane.f32.xlu0 %v2686_v60 }
0x1232   : > { %v2688_v5 = vpop.xlane.xlu0 %2687 }
0x1233   : > { %v2689_v43 = vmul.f32 0.03125, %v2688_v5 }
0x1235   : > { %v2690_v6 = vadd.f32 1e-05, %v2689_v43 }
0x1237   : > { %3401 = vrsqrt.f32 %v2690_v6 }
0x1241   : > { %v3402_v7 = vpop.eup %3401 }
0x1242   : > { %v2692_v9 = vmul.f32 %v3402_v7, %v2684_v57 }
0x1244   : > { %v2699_v11 = vmul.f32 %v3001_v8, %v2692_v9 }
0x1246   : > { %v2706_v12 = vadd.f32 %v3002_v10, %v2699_v11 }
0x1248   : > { %3252 = vmatmul.mubr.msk.f32.vlgmr.msra.gmra.mrb[0].mxu1 %vm747_vm1, %v2706_v12 }
0x131b   : > { %v2780_v13 = vpop.f32.mrb[0].mxu1 }
0x131c   : > { %v3253_v14 = vpop.f32.mrb[1].mxu1  ;;  %v2784_v15 = vmul.f32 %v2780_v13, %v2780_v13 }
0x131e   : > { %v2785_v16 = vsel %vm2679_vm7, %v2784_v15, 0.0 }
0x131f   : > { %2786 = vadd.xlane.f32.xlu1 %v2785_v16 }
0x13ac   : > { %v2787_v18 = vpop.xlane.xlu1 %2786 }
0x13ad   : > { %v2788_v20 = vmax.f32 %v2787_v18, 1e-12 }
0x13af   : > { %3403 = vrsqrt.f32 %v2788_v20 }
0x13b9   : > { %v3404_v21 = vpop.eup %3403 }
0x13ba   : > { %v2790_v22 = vmul.f32 %v3404_v21, %v2780_v13 }
0x13bc   : > { %2791 = vst.msk [vmem:[#allocation3] sm:$0x3] %vm2679_vm7, %v2790_v22 }
0x13bd PF: > { %p3323_p6 = scmp.eq.s32.totalorder %s3564_s28, 1  ;;  %s3462_s1 = smov [#allocation3]  }
0x13be   : > { %s2799_s29 = sshll.u32 %s3462_s1, 4  ;;  %s2800_s29 = int_to_ptr.vmem [resolvable:$true] %s2799_s29 }
0x13bf   : > { %s3405_s2 = scalar_lea.vmem %s2800_s29, 32  ;;  %p3412_p10 = scmp.lt.s32.totalorder %s2800_s29, %s2800_s29 }
0x13c0   : > { %p3406_p7 = scmp.ne.s32.totalorder %s2800_s29, %s3405_s2  ;;  %p3413_p11 = scmp.lt.s32.totalorder %s3405_s2, %s3405_s2 }
0x13c2   : > { %p3407_p8 = pnand %p3406_p7, %p3323_p6  ;;  %p3414_p12 = por %p3413_p11, %p3412_p10 }
0x13c4   : > { %p3408_p9 = pneg %p3407_p8 }
0x13c6   : > { %p3415_p13 = pnand %p3414_p12, %p3408_p9 }
0x13c8   : > { %3418 = shalt.err (!%p3415_p13)
}
0x13c9   : > { %s3981_s17 = sld [smem:[#allocation15_spill]] }
0x13cf   : > { %s3419_s16 = scalar_lea.hbm %s3981_s17, 32 }
0x13d0   : > { %p3420_p0 = scmp.ne.s32.totalorder %s3981_s17, %s3419_s16  ;;  %p3425_p3 = scmp.lt.u32.totalorder %s3419_s16, %s3981_s17 }
0x13d2   : > { %p3421_p1 = pnand %p3420_p0, %p3323_p6 }
0x13d4   : > { %p3422_p2 = pneg %p3421_p1 }
0x13d6   : > { %p3427_p4 = pnand %p3425_p3, %p3422_p2 }
0x13d8   : > { %3430 = shalt.err (!%p3427_p4)
}
0x13d9   : > { %3320 = dma.vmem_to_hbm [thread:$0]  (%p3323_p6), %s2800_s29, 32, %s3981_s17, [#allocation4]  }
0x13da   : > { %3436 = dma.done.wait (%p3323_p6), [#allocation4], 32  }
0x13db   : > { %3438 = vsyncadd (%p3323_p6), [#allocation4], 4294967264 }
0x13dc PF: > { %s3982_s5 = sld [smem:[#allocation6_spill]] }
0x13e2   : > { %s29_s27 = sadd.s32 1, %s3982_s5  }
0x13e3   : > { %p26_p5 = scmp.ge.s32.totalorder %s29_s27, 4  }
0x13e5   :  { %28 = sbr.rel (!%p26_p5) target bundleno = 11 (0xb), region = 160 }
0x13ec   :  { %2812 = vsyncpa [#allocation4], 1 }
0x13ed   :  { %2814 = vsyncpa [#allocation4 + $0x1], 1 }

</bundles_post_ra>
